<compile_context>
chip_gen: v7x
topology: tpu7x:2x2x1
jax: 0.10.0
libtpu: 0.0.40
codegen_flags: <defaults>
</compile_context>

<pallas_src>
import jax
import jax.numpy as jnp
import numpy as np
from jax.experimental import pallas as pl
from jax.experimental.pallas import tpu as pltpu


def _vmem_limit_bytes(default=64 * 1024 * 1024):
    """Per-generation VMEM budget (3/4 of capacity, capped at 100 MiB)."""
    try:
        cap = int(getattr(pltpu.get_tpu_info(), "vmem_capacity_bytes",
                          128 * 1024 * 1024))
    except Exception:
        return default
    return int(min(max(cap * 3 // 4, 32 * 1024 * 1024), 100 * 1024 * 1024))


def make_block_kernel(n_head, head_size, batch_block, eps=1e-5,
                      compute_dtype=jnp.bfloat16):
    H, D, bb = n_head, head_size, batch_block

    def kernel(x_ref, wqkv_ref, wpg_ref, bp_ref,
               ln1w_ref, ln1b_ref, ln2w_ref, ln2b_ref,
               w1_ref, b1_ref, w2_ref, b2_ref, bias_ref,
               attm_ref, out_ref):
        _, T, E = x_ref.shape
        N = bb * T
        x = x_ref[...].reshape(N, E)                       # (bb*T, E) f32

        def layernorm(v, w, b):                            # f32 VPU math
            mu = jnp.mean(v, axis=-1, keepdims=True)
            var = jnp.mean((v - mu) ** 2, axis=-1, keepdims=True)
            return (v - mu) * jax.lax.rsqrt(var + eps) * w + b

        xn = layernorm(x, ln1w_ref[...], ln1b_ref[...])    # (N, E) f32
        xn_c = xn.astype(compute_dtype)

        # ---- Fused QKV: a single wide bf16 MXU matmul with f32 accumulation.
        # Columns are [Wq | Wk | Wv*scale], head-major within each block.
        qkv = jnp.dot(xn_c, wqkv_ref[...],
                      preferred_element_type=jnp.float32)  # (N, 3E) f32

        def split_heads(col0):
            # (N, 3E) -> (H, N, D) -> (H*bb, T, D);  group index g = h*bb + b.
            cols = [qkv[:, col0 + h * D: col0 + (h + 1) * D] for h in range(H)]
            stacked = jnp.stack(cols, axis=0)              # (H, N, D)
            return stacked.reshape(H * bb, T, D).astype(compute_dtype)

        q = split_heads(0)
        k = split_heads(E)
        v = split_heads(2 * E)          # V scale pre-folded into the weight

        # ---- Attention logits for all heads/batch-rows in one batched matmul.
        wei = jnp.einsum('gtd,gsd->gts', q, k,
                         preferred_element_type=jnp.float32)   # (H*bb, T, T)
        wei = wei + bias_ref[...]        # precomputed causal bias (0 / -1e30)

        # Numerically-stable softmax in f32; reciprocal on the EUP slot.
        wei = wei - jnp.max(wei, axis=-1, keepdims=True)
        e = jnp.exp(wei)
        att = e * pl.reciprocal(jnp.sum(e, axis=-1, keepdims=True), approx=True)
        attm_ref[...] = att.reshape(H, bb, T, T).astype(attm_ref.dtype)
        # TODO(synk): nn.Dropout on attention is stochastic in train mode;
        # identity (eval) semantics used here.

        ho = jnp.einsum('gts,gsd->gtd', att.astype(compute_dtype), v,
                        preferred_element_type=jnp.float32)    # (H*bb, T, D)

        # ---- Output projection: head-batched MXU matmul, then a cheap
        # leading-axis head sum (no lane-axis concatenate).
        sa = jnp.einsum('gtd,gde->gte', ho.astype(compute_dtype), wpg_ref[...],
                        preferred_element_type=jnp.float32)    # (H*bb, T, E)
        sa = sa.reshape(H, bb, T, E).sum(axis=0).reshape(N, E) + bp_ref[...]

        x1 = xn + sa        # residual on top of LN1 output (matches reference)
        xn2 = layernorm(x1, ln2w_ref[...], ln2b_ref[...])
        h1 = jnp.maximum(
            jnp.dot(xn2.astype(compute_dtype), w1_ref[...],
                    preferred_element_type=jnp.float32) + b1_ref[...], 0.0)
        ff = jnp.dot(h1.astype(compute_dtype), w2_ref[...],
                     preferred_element_type=jnp.float32) + b2_ref[...]
        out_ref[...] = (x1 + ff).reshape(bb, T, E).astype(out_ref.dtype)

    return kernel


def block_forward(x, params, n_head, *, batch_block=None,
                  compute_dtype=jnp.bfloat16, attm_dtype=jnp.float32):
    B, T, E = x.shape
    assert E % n_head == 0
    H = n_head
    D = E // n_head

    if batch_block is None:
        # At small shapes, fold several batch rows into one grid step so the
        # 8-sublane axis is filled and per-step overhead is amortized; keep a
        # per-batch grid once T is large enough to fill tiles on its own.
        batch_block = B if (T % 8 == 0 and T * E <= 128 * 128
                            and B * T <= 1024) else 1
    while B % batch_block:
        batch_block -= 1
    bb = batch_block
    grid = (B // bb,)

    c = compute_dtype
    scale = D ** -0.5

    # ---- One-time weight prep outside the kernel (halves weight DMA via bf16).
    # Fused QKV weight (E, 3E): [Wq | Wk | Wv*scale]; scale folded in f32
    # before the bf16 cast.
    wqkv = jnp.concatenate(
        [params["wq"], params["wk"], params["wv"] * scale], axis=1).astype(c)
    # Output projection split per head (H, D, E), replicated per batch row in
    # the block so the in-kernel projection is one batched matmul.
    wp3 = params["wp"].reshape(H, D, E)
    wpg = jnp.broadcast_to(wp3[:, None], (H, bb, D, E)).reshape(H * bb, D, E).astype(c)
    w1 = params["w1"].astype(c)
    w2 = params["w2"].astype(c)
    # Causal additive bias computed once (hoisted out of the per-step body);
    # finite -1e30 avoids any -inf - -inf NaN hazard.
    causal = jnp.tril(jnp.ones((T, T), bool))
    bias = jnp.where(causal, 0.0, -1e30).astype(jnp.float32)

    weights = [wqkv, wpg, params["bp"],
               params["ln1w"], params["ln1b"], params["ln2w"], params["ln2b"],
               w1, params["b1"], w2, params["b2"], bias]

    def const_spec(a):
        nd = a.ndim
        return pl.BlockSpec(a.shape, lambda b, _nd=nd: (0,) * _nd)
    # TODO(synk): on v7x mark these constant-index weight specs with
    # pipeline_mode=pl.Buffered(1) to skip double-buffering them.

    in_specs = [pl.BlockSpec((bb, T, E), lambda b: (b, 0, 0))] + \
               [const_spec(w) for w in weights]

    out_specs = (
        pl.BlockSpec((H, bb, T, T), lambda b: (0, b, 0, 0)),
        pl.BlockSpec((bb, T, E), lambda b: (b, 0, 0)),
    )
    out_shape = (
        jax.ShapeDtypeStruct((H, B, T, T), attm_dtype),
        jax.ShapeDtypeStruct((B, T, E), x.dtype),
    )

    kernel = make_block_kernel(H, D, bb, compute_dtype=compute_dtype)

    return pl.pallas_call(
        kernel,
        grid=grid,
        in_specs=in_specs,
        out_specs=out_specs,
        out_shape=out_shape,
        compiler_params=pltpu.CompilerParams(
            dimension_semantics=("parallel",),     # batch steps are independent
            vmem_limit_bytes=_vmem_limit_bytes()),
    )(x, *weights)


def ref_block(x, p, n_head):
    """Pure-JAX f32 reference mirroring the PyTorch forward (eval mode)."""
    B, T, E = x.shape
    H = E // n_head

    def ln(v, w, b):
        mu = v.mean(-1, keepdims=True)
        var = ((v - mu) ** 2).mean(-1, keepdims=True)
        return (v - mu) / jnp.sqrt(var + 1e-5) * w + b

    xn = ln(x, p["ln1w"][0], p["ln1b"][0])
    q = xn @ p["wq"]
    k = xn @ p["wk"]
    v = (xn @ p["wv"]) * (H ** -0.5)
    mask = jnp.tril(jnp.ones((T, T), bool))
    attms, outs = [], []
    for h in range(n_head):
        s = slice(h * H, (h + 1) * H)
        wei = q[..., s] @ jnp.swapaxes(k[..., s], -1, -2)
        wei = jnp.where(mask, wei, -jnp.inf)
        a = jax.nn.softmax(wei, -1)
        attms.append(a)
        outs.append(a @ v[..., s])
    sa = jnp.concatenate(outs, -1) @ p["wp"] + p["bp"][0]
    x1 = xn + sa
    xn2 = ln(x1, p["ln2w"][0], p["ln2b"][0])
    ff = jnp.maximum(xn2 @ p["w1"] + p["b1"][0], 0.0) @ p["w2"] + p["b2"][0]
    return jnp.stack(attms), x1 + ff


if __name__ == "__main__":
    B, T, E, n_head, n_hidden = 2, 8, 32, 4, 64

    key = jax.random.PRNGKey(0)
    ks = jax.random.split(key, 10)

    def init(k, shape, scale=0.05):
        return (scale * jax.random.normal(k, shape)).astype(jnp.float32)

    params = dict(
        wq=init(ks[0], (E, E)), wk=init(ks[1], (E, E)), wv=init(ks[2], (E, E)),
        wp=init(ks[3], (E, E)), bp=init(ks[4], (1, E)),
        ln1w=jnp.ones((1, E), jnp.float32), ln1b=jnp.zeros((1, E), jnp.float32),
        ln2w=jnp.ones((1, E), jnp.float32), ln2b=jnp.zeros((1, E), jnp.float32),
        w1=init(ks[5], (E, n_hidden)), b1=init(ks[6], (1, n_hidden)),
        w2=init(ks[7], (n_hidden, E)), b2=init(ks[8], (1, E)),
    )
    x = jax.random.normal(ks[9], (B, T, E), jnp.float32)

    attm, out = block_forward(x, params, n_head)
    jax.block_until_ready(out)

    attm_ref, out_ref = ref_block(x, params, n_head)
    assert attm.shape == (n_head, B, T, T) and out.shape == (B, T, E)
    # Kernel runs matmuls with bf16 inputs (f32 accumulation) → tolerances are
    # loosened vs. the pure-f32 reference.
    np.testing.assert_allclose(np.asarray(attm), np.asarray(attm_ref),
                               atol=2e-2, rtol=2e-2)
    np.testing.assert_allclose(np.asarray(out), np.asarray(out_ref),
                               atol=2e-2, rtol=2e-2)

    print("KERNEL_OK")
</pallas_src>

<mosaic_0001>
module attributes {stable_mosaic.version = 11 : i64} {
  func.func @kernel(%arg0: i32, %arg1: memref<2x8x32xf32, #tpu.memory_space<vmem>>, %arg2: memref<32x96xbf16, #tpu.memory_space<vmem>>, %arg3: memref<8x8x32xbf16, #tpu.memory_space<vmem>>, %arg4: memref<1x32xf32, #tpu.memory_space<vmem>>, %arg5: memref<1x32xf32, #tpu.memory_space<vmem>>, %arg6: memref<1x32xf32, #tpu.memory_space<vmem>>, %arg7: memref<1x32xf32, #tpu.memory_space<vmem>>, %arg8: memref<1x32xf32, #tpu.memory_space<vmem>>, %arg9: memref<32x64xbf16, #tpu.memory_space<vmem>>, %arg10: memref<1x64xf32, #tpu.memory_space<vmem>>, %arg11: memref<64x32xbf16, #tpu.memory_space<vmem>>, %arg12: memref<1x32xf32, #tpu.memory_space<vmem>>, %arg13: memref<8x8xf32, #tpu.memory_space<vmem>>, %arg14: memref<4x2x8x8xf32, #tpu.memory_space<vmem>>, %arg15: memref<2x8x32xf32, #tpu.memory_space<vmem>>) attributes {dimension_semantics = [#tpu.dimension_semantics<parallel>], iteration_bounds = array<i64: 1>, scalar_prefetch = 0 : i64, scratch_operands = 0 : i64, tpu.core_type = #tpu.core_type<tc>, window_params = [{transform_indices = @transform_0, window_bounds = array<i64: 2, 8, 32>}, {pipeline_mode = #tpu.pipeline_mode<synchronous>, transform_indices = @transform_1, window_bounds = array<i64: 32, 96>}, {pipeline_mode = #tpu.pipeline_mode<synchronous>, transform_indices = @transform_2, window_bounds = array<i64: 8, 8, 32>}, {pipeline_mode = #tpu.pipeline_mode<synchronous>, transform_indices = @transform_3, window_bounds = array<i64: 1, 32>}, {pipeline_mode = #tpu.pipeline_mode<synchronous>, transform_indices = @transform_4, window_bounds = array<i64: 1, 32>}, {pipeline_mode = #tpu.pipeline_mode<synchronous>, transform_indices = @transform_5, window_bounds = array<i64: 1, 32>}, {pipeline_mode = #tpu.pipeline_mode<synchronous>, transform_indices = @transform_6, window_bounds = array<i64: 1, 32>}, {pipeline_mode = #tpu.pipeline_mode<synchronous>, transform_indices = @transform_7, window_bounds = array<i64: 1, 32>}, {pipeline_mode = #tpu.pipeline_mode<synchronous>, transform_indices = @transform_8, window_bounds = array<i64: 32, 64>}, {pipeline_mode = #tpu.pipeline_mode<synchronous>, transform_indices = @transform_9, window_bounds = array<i64: 1, 64>}, {pipeline_mode = #tpu.pipeline_mode<synchronous>, transform_indices = @transform_10, window_bounds = array<i64: 64, 32>}, {pipeline_mode = #tpu.pipeline_mode<synchronous>, transform_indices = @transform_11, window_bounds = array<i64: 1, 32>}, {pipeline_mode = #tpu.pipeline_mode<synchronous>, transform_indices = @transform_12, window_bounds = array<i64: 8, 8>}, {transform_indices = @transform_13, window_bounds = array<i64: 4, 2, 8, 8>}, {transform_indices = @transform_14, window_bounds = array<i64: 2, 8, 32>}]} {
    %c0 = arith.constant 0 : index
    %c0_0 = arith.constant 0 : index
    %c0_1 = arith.constant 0 : index
    %0 = vector.load %arg1[%c0, %c0_0, %c0_1] : memref<2x8x32xf32, #tpu.memory_space<vmem>>, vector<2x8x32xf32>
    %1 = vector.shape_cast %0 : vector<2x8x32xf32> to vector<16x32xf32>
    %c0_2 = arith.constant 0 : index
    %c0_3 = arith.constant 0 : index
    %2 = vector.load %arg5[%c0_2, %c0_3] : memref<1x32xf32, #tpu.memory_space<vmem>>, vector<1x32xf32>
    %c0_4 = arith.constant 0 : index
    %c0_5 = arith.constant 0 : index
    %3 = vector.load %arg6[%c0_4, %c0_5] : memref<1x32xf32, #tpu.memory_space<vmem>>, vector<1x32xf32>
    %cst = arith.constant dense<0.000000e+00> : vector<16xf32>
    %4 = vector.multi_reduction <add>, %1, %cst [1] : vector<16x32xf32> to vector<16xf32>
    %5 = vector.shape_cast %4 : vector<16xf32> to vector<16x1xf32>
    %cst_6 = arith.constant 3.200000e+01 : f32
    %6 = vector.broadcast %cst_6 : f32 to vector<16x1xf32>
    %7 = arith.divf %5, %6 : vector<16x1xf32>
    %8 = vector.broadcast %7 : vector<16x1xf32> to vector<16x32xf32>
    %9 = arith.subf %1, %8 : vector<16x32xf32>
    %10 = arith.mulf %9, %9 : vector<16x32xf32>
    %cst_7 = arith.constant dense<0.000000e+00> : vector<16xf32>
    %11 = vector.multi_reduction <add>, %10, %cst_7 [1] : vector<16x32xf32> to vector<16xf32>
    %12 = vector.shape_cast %11 : vector<16xf32> to vector<16x1xf32>
    %cst_8 = arith.constant 3.200000e+01 : f32
    %13 = vector.broadcast %cst_8 : f32 to vector<16x1xf32>
    %14 = arith.divf %12, %13 : vector<16x1xf32>
    %15 = vector.broadcast %7 : vector<16x1xf32> to vector<16x32xf32>
    %16 = arith.subf %1, %15 : vector<16x32xf32>
    %cst_9 = arith.constant 9.99999974E-6 : f32
    %17 = vector.broadcast %cst_9 : f32 to vector<16x1xf32>
    %18 = arith.addf %14, %17 : vector<16x1xf32>
    %19 = math.rsqrt %18 : vector<16x1xf32>
    %20 = vector.broadcast %19 : vector<16x1xf32> to vector<16x32xf32>
    %21 = arith.mulf %16, %20 : vector<16x32xf32>
    %22 = vector.broadcast %2 : vector<1x32xf32> to vector<16x32xf32>
    %23 = arith.mulf %21, %22 : vector<16x32xf32>
    %24 = vector.broadcast %3 : vector<1x32xf32> to vector<16x32xf32>
    %25 = arith.addf %23, %24 : vector<16x32xf32>
    %26 = arith.truncf %25 : vector<16x32xf32> to vector<16x32xbf16>
    %c0_10 = arith.constant 0 : index
    %c0_11 = arith.constant 0 : index
    %27 = vector.load %arg2[%c0_10, %c0_11] : memref<32x96xbf16, #tpu.memory_space<vmem>>, vector<32x96xbf16>
    %cst_12 = arith.constant dense<0.000000e+00> : vector<16x96xf32>
    %28 = tpu.matmul %26, %27, %cst_12 {dimension_numbers = #tpu.dot_dimension_numbers<[1], [0], [0], [1], [0, 0, 1, 1], [], []>} : vector<16x32xbf16>, vector<32x96xbf16>, vector<16x96xf32> -> vector<16x96xf32>
    %29 = vector.extract_strided_slice %28 {offsets = [0, 0], sizes = [16, 8], strides = [1, 1]} : vector<16x96xf32> to vector<16x8xf32>
    %30 = vector.extract_strided_slice %28 {offsets = [0, 8], sizes = [16, 8], strides = [1, 1]} : vector<16x96xf32> to vector<16x8xf32>
    %31 = vector.extract_strided_slice %28 {offsets = [0, 16], sizes = [16, 8], strides = [1, 1]} : vector<16x96xf32> to vector<16x8xf32>
    %32 = vector.extract_strided_slice %28 {offsets = [0, 24], sizes = [16, 8], strides = [1, 1]} : vector<16x96xf32> to vector<16x8xf32>
    %33 = vector.shape_cast %29 : vector<16x8xf32> to vector<1x16x8xf32>
    %34 = vector.shape_cast %30 : vector<16x8xf32> to vector<1x16x8xf32>
    %35 = vector.shape_cast %31 : vector<16x8xf32> to vector<1x16x8xf32>
    %36 = vector.shape_cast %32 : vector<16x8xf32> to vector<1x16x8xf32>
    %37 = tpu.concatenate %33, %34, %35, %36 in 0 : vector<1x16x8xf32>, vector<1x16x8xf32>, vector<1x16x8xf32>, vector<1x16x8xf32> -> vector<4x16x8xf32>
    %38 = vector.shape_cast %37 : vector<4x16x8xf32> to vector<8x8x8xf32>
    %39 = arith.truncf %38 : vector<8x8x8xf32> to vector<8x8x8xbf16>
    %40 = vector.extract_strided_slice %28 {offsets = [0, 32], sizes = [16, 8], strides = [1, 1]} : vector<16x96xf32> to vector<16x8xf32>
    %41 = vector.extract_strided_slice %28 {offsets = [0, 40], sizes = [16, 8], strides = [1, 1]} : vector<16x96xf32> to vector<16x8xf32>
    %42 = vector.extract_strided_slice %28 {offsets = [0, 48], sizes = [16, 8], strides = [1, 1]} : vector<16x96xf32> to vector<16x8xf32>
    %43 = vector.extract_strided_slice %28 {offsets = [0, 56], sizes = [16, 8], strides = [1, 1]} : vector<16x96xf32> to vector<16x8xf32>
    %44 = vector.shape_cast %40 : vector<16x8xf32> to vector<1x16x8xf32>
    %45 = vector.shape_cast %41 : vector<16x8xf32> to vector<1x16x8xf32>
    %46 = vector.shape_cast %42 : vector<16x8xf32> to vector<1x16x8xf32>
    %47 = vector.shape_cast %43 : vector<16x8xf32> to vector<1x16x8xf32>
    %48 = tpu.concatenate %44, %45, %46, %47 in 0 : vector<1x16x8xf32>, vector<1x16x8xf32>, vector<1x16x8xf32>, vector<1x16x8xf32> -> vector<4x16x8xf32>
    %49 = vector.shape_cast %48 : vector<4x16x8xf32> to vector<8x8x8xf32>
    %50 = arith.truncf %49 : vector<8x8x8xf32> to vector<8x8x8xbf16>
    %51 = vector.extract_strided_slice %28 {offsets = [0, 64], sizes = [16, 8], strides = [1, 1]} : vector<16x96xf32> to vector<16x8xf32>
    %52 = vector.extract_strided_slice %28 {offsets = [0, 72], sizes = [16, 8], strides = [1, 1]} : vector<16x96xf32> to vector<16x8xf32>
    %53 = vector.extract_strided_slice %28 {offsets = [0, 80], sizes = [16, 8], strides = [1, 1]} : vector<16x96xf32> to vector<16x8xf32>
    %54 = vector.extract_strided_slice %28 {offsets = [0, 88], sizes = [16, 8], strides = [1, 1]} : vector<16x96xf32> to vector<16x8xf32>
    %55 = vector.shape_cast %51 : vector<16x8xf32> to vector<1x16x8xf32>
    %56 = vector.shape_cast %52 : vector<16x8xf32> to vector<1x16x8xf32>
    %57 = vector.shape_cast %53 : vector<16x8xf32> to vector<1x16x8xf32>
    %58 = vector.shape_cast %54 : vector<16x8xf32> to vector<1x16x8xf32>
    %59 = tpu.concatenate %55, %56, %57, %58 in 0 : vector<1x16x8xf32>, vector<1x16x8xf32>, vector<1x16x8xf32>, vector<1x16x8xf32> -> vector<4x16x8xf32>
    %60 = vector.shape_cast %59 : vector<4x16x8xf32> to vector<8x8x8xf32>
    %61 = arith.truncf %60 : vector<8x8x8xf32> to vector<8x8x8xbf16>
    "tpu.trace_start"() <{level = 10 : i32, message = "gtd,gsd->gts"}> : () -> ()
    %cst_13 = arith.constant dense<0.000000e+00> : vector<8x8x8xf32>
    %62 = tpu.matmul %39, %50, %cst_13 {dimension_numbers = #tpu.dot_dimension_numbers<[2], [2], [1], [1], [0, 0, 0, 1, 1, 1], [0], [0]>} : vector<8x8x8xbf16>, vector<8x8x8xbf16>, vector<8x8x8xf32> -> vector<8x8x8xf32>
    "tpu.trace_stop"() : () -> ()
    %c0_14 = arith.constant 0 : index
    %c0_15 = arith.constant 0 : index
    %63 = vector.load %arg13[%c0_14, %c0_15] : memref<8x8xf32, #tpu.memory_space<vmem>>, vector<8x8xf32>
    %64 = vector.shape_cast %63 : vector<8x8xf32> to vector<1x8x8xf32>
    %65 = vector.broadcast %64 : vector<1x8x8xf32> to vector<8x8x8xf32>
    %66 = arith.addf %62, %65 : vector<8x8x8xf32>
    %cst_16 = arith.constant dense<0xFF800000> : vector<8x8xf32>
    %67 = vector.multi_reduction <maximumf>, %66, %cst_16 [2] : vector<8x8x8xf32> to vector<8x8xf32>
    %68 = vector.shape_cast %67 : vector<8x8xf32> to vector<8x8x1xf32>
    %69 = vector.broadcast %68 : vector<8x8x1xf32> to vector<8x8x8xf32>
    %70 = arith.subf %66, %69 : vector<8x8x8xf32>
    %71 = math.exp %70 : vector<8x8x8xf32>
    %cst_17 = arith.constant dense<0.000000e+00> : vector<8x8xf32>
    %72 = vector.multi_reduction <add>, %71, %cst_17 [2] : vector<8x8x8xf32> to vector<8x8xf32>
    %73 = vector.shape_cast %72 : vector<8x8xf32> to vector<8x8x1xf32>
    %74 = tpu.reciprocal %73 {approx = true} : vector<8x8x1xf32> -> vector<8x8x1xf32>
    %75 = vector.broadcast %74 : vector<8x8x1xf32> to vector<8x8x8xf32>
    %76 = arith.mulf %71, %75 : vector<8x8x8xf32>
    %77 = vector.shape_cast %76 : vector<8x8x8xf32> to vector<4x2x8x8xf32>
    %c0_18 = arith.constant 0 : index
    %c0_19 = arith.constant 0 : index
    %c0_20 = arith.constant 0 : index
    %c0_21 = arith.constant 0 : index
    %78 = vector.load %arg14[%c0_18, %c0_19, %c0_20, %c0_21] : memref<4x2x8x8xf32, #tpu.memory_space<vmem>>, vector<4x2x8x8xf32>
    tpu.vector_store %arg14[%c0_18, %c0_19, %c0_20, %c0_21], %77 {strides = array<i32>} : memref<4x2x8x8xf32, #tpu.memory_space<vmem>>, vector<4x2x8x8xf32>,
    %79 = arith.truncf %76 : vector<8x8x8xf32> to vector<8x8x8xbf16>
    "tpu.trace_start"() <{level = 10 : i32, message = "gts,gsd->gtd"}> : () -> ()
    %cst_22 = arith.constant dense<0.000000e+00> : vector<8x8x8xf32>
    %80 = tpu.matmul %79, %61, %cst_22 {dimension_numbers = #tpu.dot_dimension_numbers<[2], [1], [1], [2], [0, 0, 0, 1, 1, 2], [0], [0]>} : vector<8x8x8xbf16>, vector<8x8x8xbf16>, vector<8x8x8xf32> -> vector<8x8x8xf32>
    "tpu.trace_stop"() : () -> ()
    %81 = arith.truncf %80 : vector<8x8x8xf32> to vector<8x8x8xbf16>
    %c0_23 = arith.constant 0 : index
    %c0_24 = arith.constant 0 : index
    %c0_25 = arith.constant 0 : index
    %82 = vector.load %arg3[%c0_23, %c0_24, %c0_25] : memref<8x8x32xbf16, #tpu.memory_space<vmem>>, vector<8x8x32xbf16>
    "tpu.trace_start"() <{level = 10 : i32, message = "gtd,gde->gte"}> : () -> ()
    %cst_26 = arith.constant dense<0.000000e+00> : vector<8x8x32xf32>
    %83 = tpu.matmul %81, %82, %cst_26 {dimension_numbers = #tpu.dot_dimension_numbers<[2], [1], [1], [2], [0, 0, 0, 1, 1, 2], [0], [0]>} : vector<8x8x8xbf16>, vector<8x8x32xbf16>, vector<8x8x32xf32> -> vector<8x8x32xf32>
    "tpu.trace_stop"() : () -> ()
    %84 = vector.shape_cast %83 : vector<8x8x32xf32> to vector<4x2x8x32xf32>
    %cst_27 = arith.constant dense<0.000000e+00> : vector<2x8x32xf32>
    %85 = vector.multi_reduction <add>, %84, %cst_27 [0] : vector<4x2x8x32xf32> to vector<2x8x32xf32>
    %86 = vector.shape_cast %85 : vector<2x8x32xf32> to vector<16x32xf32>
    %c0_28 = arith.constant 0 : index
    %c0_29 = arith.constant 0 : index
    %87 = vector.load %arg4[%c0_28, %c0_29] : memref<1x32xf32, #tpu.memory_space<vmem>>, vector<1x32xf32>
    %88 = vector.broadcast %87 : vector<1x32xf32> to vector<16x32xf32>
    %89 = arith.addf %86, %88 : vector<16x32xf32>
    %90 = arith.addf %25, %89 : vector<16x32xf32>
    %c0_30 = arith.constant 0 : index
    %c0_31 = arith.constant 0 : index
    %91 = vector.load %arg7[%c0_30, %c0_31] : memref<1x32xf32, #tpu.memory_space<vmem>>, vector<1x32xf32>
    %c0_32 = arith.constant 0 : index
    %c0_33 = arith.constant 0 : index
    %92 = vector.load %arg8[%c0_32, %c0_33] : memref<1x32xf32, #tpu.memory_space<vmem>>, vector<1x32xf32>
    %cst_34 = arith.constant dense<0.000000e+00> : vector<16xf32>
    %93 = vector.multi_reduction <add>, %90, %cst_34 [1] : vector<16x32xf32> to vector<16xf32>
    %94 = vector.shape_cast %93 : vector<16xf32> to vector<16x1xf32>
    %cst_35 = arith.constant 3.200000e+01 : f32
    %95 = vector.broadcast %cst_35 : f32 to vector<16x1xf32>
    %96 = arith.divf %94, %95 : vector<16x1xf32>
    %97 = vector.broadcast %96 : vector<16x1xf32> to vector<16x32xf32>
    %98 = arith.subf %90, %97 : vector<16x32xf32>
    %99 = arith.mulf %98, %98 : vector<16x32xf32>
    %cst_36 = arith.constant dense<0.000000e+00> : vector<16xf32>
    %100 = vector.multi_reduction <add>, %99, %cst_36 [1] : vector<16x32xf32> to vector<16xf32>
    %101 = vector.shape_cast %100 : vector<16xf32> to vector<16x1xf32>
    %cst_37 = arith.constant 3.200000e+01 : f32
    %102 = vector.broadcast %cst_37 : f32 to vector<16x1xf32>
    %103 = arith.divf %101, %102 : vector<16x1xf32>
    %104 = vector.broadcast %96 : vector<16x1xf32> to vector<16x32xf32>
    %105 = arith.subf %90, %104 : vector<16x32xf32>
    %cst_38 = arith.constant 9.99999974E-6 : f32
    %106 = vector.broadcast %cst_38 : f32 to vector<16x1xf32>
    %107 = arith.addf %103, %106 : vector<16x1xf32>
    %108 = math.rsqrt %107 : vector<16x1xf32>
    %109 = vector.broadcast %108 : vector<16x1xf32> to vector<16x32xf32>
    %110 = arith.mulf %105, %109 : vector<16x32xf32>
    %111 = vector.broadcast %91 : vector<1x32xf32> to vector<16x32xf32>
    %112 = arith.mulf %110, %111 : vector<16x32xf32>
    %113 = vector.broadcast %92 : vector<1x32xf32> to vector<16x32xf32>
    %114 = arith.addf %112, %113 : vector<16x32xf32>
    %115 = arith.truncf %114 : vector<16x32xf32> to vector<16x32xbf16>
    %c0_39 = arith.constant 0 : index
    %c0_40 = arith.constant 0 : index
    %116 = vector.load %arg9[%c0_39, %c0_40] : memref<32x64xbf16, #tpu.memory_space<vmem>>, vector<32x64xbf16>
    %cst_41 = arith.constant dense<0.000000e+00> : vector<16x64xf32>
    %117 = tpu.matmul %115, %116, %cst_41 {dimension_numbers = #tpu.dot_dimension_numbers<[1], [0], [0], [1], [0, 0, 1, 1], [], []>} : vector<16x32xbf16>, vector<32x64xbf16>, vector<16x64xf32> -> vector<16x64xf32>
    %c0_42 = arith.constant 0 : index
    %c0_43 = arith.constant 0 : index
    %118 = vector.load %arg10[%c0_42, %c0_43] : memref<1x64xf32, #tpu.memory_space<vmem>>, vector<1x64xf32>
    %119 = vector.broadcast %118 : vector<1x64xf32> to vector<16x64xf32>
    %120 = arith.addf %117, %119 : vector<16x64xf32>
    %cst_44 = arith.constant 0.000000e+00 : f32
    %121 = vector.broadcast %cst_44 : f32 to vector<16x64xf32>
    %122 = arith.maximumf %120, %121 : vector<16x64xf32>
    %123 = arith.truncf %122 : vector<16x64xf32> to vector<16x64xbf16>
    %c0_45 = arith.constant 0 : index
    %c0_46 = arith.constant 0 : index
    %124 = vector.load %arg11[%c0_45, %c0_46] : memref<64x32xbf16, #tpu.memory_space<vmem>>, vector<64x32xbf16>
    %cst_47 = arith.constant dense<0.000000e+00> : vector<16x32xf32>
    %125 = tpu.matmul %123, %124, %cst_47 {dimension_numbers = #tpu.dot_dimension_numbers<[1], [0], [0], [1], [0, 0, 1, 1], [], []>} : vector<16x64xbf16>, vector<64x32xbf16>, vector<16x32xf32> -> vector<16x32xf32>
    %c0_48 = arith.constant 0 : index
    %c0_49 = arith.constant 0 : index
    %126 = vector.load %arg12[%c0_48, %c0_49] : memref<1x32xf32, #tpu.memory_space<vmem>>, vector<1x32xf32>
    %127 = vector.broadcast %126 : vector<1x32xf32> to vector<16x32xf32>
    %128 = arith.addf %125, %127 : vector<16x32xf32>
    %129 = arith.addf %90, %128 : vector<16x32xf32>
    %130 = vector.shape_cast %129 : vector<16x32xf32> to vector<2x8x32xf32>
    %c0_50 = arith.constant 0 : index
    %c0_51 = arith.constant 0 : index
    %c0_52 = arith.constant 0 : index
    %131 = vector.load %arg15[%c0_50, %c0_51, %c0_52] : memref<2x8x32xf32, #tpu.memory_space<vmem>>, vector<2x8x32xf32>
    tpu.vector_store %arg15[%c0_50, %c0_51, %c0_52], %130 {strides = array<i32>} : memref<2x8x32xf32, #tpu.memory_space<vmem>>, vector<2x8x32xf32>,
    return
  }
  func.func @transform_0(%arg0: i32) -> (i32, i32, i32) {
    %c0_i32 = arith.constant 0 : i32
    %c0_i32_0 = arith.constant 0 : i32
    %c0_i32_1 = arith.constant 0 : i32
    return %arg0, %c0_i32, %c0_i32_0 : i32, i32, i32
  }
  func.func @transform_1(%arg0: i32) -> (i32, i32) {
    %c0_i32 = arith.constant 0 : i32
    %c0_i32_0 = arith.constant 0 : i32
    %c0_i32_1 = arith.constant 0 : i32
    return %c0_i32, %c0_i32_0 : i32, i32
  }
  func.func @transform_2(%arg0: i32) -> (i32, i32, i32) {
    %c0_i32 = arith.constant 0 : i32
    %c0_i32_0 = arith.constant 0 : i32
    %c0_i32_1 = arith.constant 0 : i32
    %c0_i32_2 = arith.constant 0 : i32
    return %c0_i32, %c0_i32_0, %c0_i32_1 : i32, i32, i32
  }
  func.func @transform_3(%arg0: i32) -> (i32, i32) {
    %c0_i32 = arith.constant 0 : i32
    %c0_i32_0 = arith.constant 0 : i32
    %c0_i32_1 = arith.constant 0 : i32
    return %c0_i32, %c0_i32_0 : i32, i32
  }
  func.func @transform_4(%arg0: i32) -> (i32, i32) {
    %c0_i32 = arith.constant 0 : i32
    %c0_i32_0 = arith.constant 0 : i32
    %c0_i32_1 = arith.constant 0 : i32
    return %c0_i32, %c0_i32_0 : i32, i32
  }
  func.func @transform_5(%arg0: i32) -> (i32, i32) {
    %c0_i32 = arith.constant 0 : i32
    %c0_i32_0 = arith.constant 0 : i32
    %c0_i32_1 = arith.constant 0 : i32
    return %c0_i32, %c0_i32_0 : i32, i32
  }
  func.func @transform_6(%arg0: i32) -> (i32, i32) {
    %c0_i32 = arith.constant 0 : i32
    %c0_i32_0 = arith.constant 0 : i32
    %c0_i32_1 = arith.constant 0 : i32
    return %c0_i32, %c0_i32_0 : i32, i32
  }
  func.func @transform_7(%arg0: i32) -> (i32, i32) {
    %c0_i32 = arith.constant 0 : i32
    %c0_i32_0 = arith.constant 0 : i32
    %c0_i32_1 = arith.constant 0 : i32
    return %c0_i32, %c0_i32_0 : i32, i32
  }
  func.func @transform_8(%arg0: i32) -> (i32, i32) {
    %c0_i32 = arith.constant 0 : i32
    %c0_i32_0 = arith.constant 0 : i32
    %c0_i32_1 = arith.constant 0 : i32
    return %c0_i32, %c0_i32_0 : i32, i32
  }
  func.func @transform_9(%arg0: i32) -> (i32, i32) {
    %c0_i32 = arith.constant 0 : i32
    %c0_i32_0 = arith.constant 0 : i32
    %c0_i32_1 = arith.constant 0 : i32
    return %c0_i32, %c0_i32_0 : i32, i32
  }
  func.func @transform_10(%arg0: i32) -> (i32, i32) {
    %c0_i32 = arith.constant 0 : i32
    %c0_i32_0 = arith.constant 0 : i32
    %c0_i32_1 = arith.constant 0 : i32
    return %c0_i32, %c0_i32_0 : i32, i32
  }
  func.func @transform_11(%arg0: i32) -> (i32, i32) {
    %c0_i32 = arith.constant 0 : i32
    %c0_i32_0 = arith.constant 0 : i32
    %c0_i32_1 = arith.constant 0 : i32
    return %c0_i32, %c0_i32_0 : i32, i32
  }
  func.func @transform_12(%arg0: i32) -> (i32, i32) {
    %c0_i32 = arith.constant 0 : i32
    %c0_i32_0 = arith.constant 0 : i32
    %c0_i32_1 = arith.constant 0 : i32
    return %c0_i32, %c0_i32_0 : i32, i32
  }
  func.func @transform_13(%arg0: i32) -> (i32, i32, i32, i32) {
    %c0_i32 = arith.constant 0 : i32
    %c0_i32_0 = arith.constant 0 : i32
    %c0_i32_1 = arith.constant 0 : i32
    %c0_i32_2 = arith.constant 0 : i32
    return %c0_i32, %arg0, %c0_i32_0, %c0_i32_1 : i32, i32, i32, i32
  }
  func.func @transform_14(%arg0: i32) -> (i32, i32, i32) {
    %c0_i32 = arith.constant 0 : i32
    %c0_i32_0 = arith.constant 0 : i32
    %c0_i32_1 = arith.constant 0 : i32
    return %arg0, %c0_i32, %c0_i32_0 : i32, i32, i32
  }
}

</mosaic_0001>

<bundles_post_ra>
// kernel: tpu_custom_call.1
= control target key start
LH: loop header
LB: loop body
LE: loop exit
PB: predicated region body
PF: predicated region fallthrough
CT: control target
= control target key end

     0   :  { %20 = vsyncpa [#allocation3], 0  ;;  %s3173_s0 = inlined_call_operand.hbm [shape: f32[2,8,32], index: 0, kind: input, shape index: {}]   ;;  %s3174_s1 = inlined_call_operand.hbm [shape: bf16[32,96], index: 1, kind: input, shape index: {}]   ;;  %s3175_s2 = inlined_call_operand.hbm [shape: bf16[8,8,32], index: 2, kind: input, shape index: {}]   ;;  %s3176_s3 = inlined_call_operand.hbm [shape: f32[1,32], index: 3, kind: input, shape index: {}]   ;;  %s3177_s4 = inlined_call_operand.hbm [shape: f32[1,32], index: 4, kind: input, shape index: {}]   ;;  %s3178_s5 = inlined_call_operand.hbm [shape: f32[1,32], index: 5, kind: input, shape index: {}]   ;;  %s3179_s6 = inlined_call_operand.hbm [shape: f32[1,32], index: 6, kind: input, shape index: {}]   ;;  %s3180_s7 = inlined_call_operand.hbm [shape: f32[1,32], index: 7, kind: input, shape index: {}]   ;;  %s3181_s8 = inlined_call_operand.hbm [shape: bf16[32,64], index: 8, kind: input, shape index: {}]   ;;  %s3182_s9 = inlined_call_operand.hbm [shape: f32[1,64], index: 9, kind: input, shape index: {}]   ;;  %s3183_s10 = inlined_call_operand.hbm [shape: bf16[64,32], index: 10, kind: input, shape index: {}]   ;;  %s3184_s11 = inlined_call_operand.hbm [shape: f32[1,32], index: 11, kind: input, shape index: {}]   ;;  %s3185_s12 = inlined_call_operand.hbm [shape: f32[8,8], index: 12, kind: input, shape index: {}]   ;;  %s3186_s13 = inlined_call_operand.hbm [shape: f32[4,2,8,8], index: 13, kind: output, shape index: {0}]   ;;  %s3187_s14 = inlined_call_operand.hbm [shape: f32[2,8,32], index: 14, kind: output, shape index: {1}]  }
   0x1   :  { %21 = vsyncpa [#allocation6], 0 }
   0x2   :  { %22 = vsyncpa [#allocation9], 0 }
   0x3   :  { %23 = vsyncpa [#allocation12], 0 }
   0x4   :  { %24 = vsyncpa [#allocation15], 0 }
   0x5   :  { %25 = vsyncpa [#allocation18], 0 }
   0x6   :  { %26 = vsyncpa [#allocation21], 0 }
   0x7   :  { %27 = vsyncpa [#allocation4], 0 }
   0x8   :  { %28 = vsyncpa [#allocation25], 0  ;;  %s2589_s29 = smov [#allocation5]   ;;  %s2241_s17 = scalar_lea.hbm %s3174_s1, 256 }
   0x9   :  { %s46_s30 = sshll.u32 %s2589_s29, 4  ;;  %p2242_p0 = scmp.ne.s32.totalorder %s3174_s1, %s2241_s17  ;;  %s47_s30 = int_to_ptr.vmem [resolvable:$true] %s46_s30 }
   0xa   :  { %p2245_p1 = scmp.lt.u32.totalorder %s2241_s17, %s3174_s1 }
   0xc   :  { %p2247_p2 = pnand %p2245_p1, %p2242_p0 }
   0xe   :  { %2250 = shalt.err (!%p2247_p2)
}
   0xf   :  { %s2251_s22 = scalar_lea.vmem %s47_s30, 256  ;;  %p2256_p4 = scmp.lt.s32.totalorder %s47_s30, %s47_s30 }
  0x10   :  { %p2252_p3 = scmp.ne.s32.totalorder %s47_s30, %s2251_s22  ;;  %p2257_p5 = scmp.lt.s32.totalorder %s2251_s22, %s2251_s22 }
  0x12   :  { %p2258_p6 = por %p2257_p5, %p2256_p4 }
  0x14   :  { %p2259_p7 = pnand %p2258_p6, %p2252_p3 }
  0x16   :  { %2262 = shalt.err (!%p2259_p7)
}
  0x17   :  { %s2590_s23 = smov 64   ;;  %s2591_s24 = smov 4  }
  0x18   :  { %52 = dma.hbm_to_vmem [thread:$0]  %s3174_s1, 256, %s47_s30, [#allocation6], %s2590_s23, %s2590_s23, %s2591_s24  }
  0x19   :  { %s2592_s27 = smov [#allocation8]   ;;  %s2593_s29 = smov [#allocation11]  }
  0x1a   :  { %s71_s28 = sshll.u32 %s2592_s27, 4  ;;  %s91_s15 = sshll.u32 %s2593_s29, 4  ;;  %s72_s28 = int_to_ptr.vmem [resolvable:$true] %s71_s28  ;;  %s92_s15 = int_to_ptr.vmem [resolvable:$true] %s91_s15 }
  0x1b   :  { %s2263_s18 = scalar_lea.hbm %s3176_s3, 16 }
  0x1c   :  { %p2264_p8 = scmp.ne.s32.totalorder %s3176_s3, %s2263_s18  ;;  %p2267_p9 = scmp.lt.u32.totalorder %s2263_s18, %s3176_s3 }
  0x1e   :  { %p2269_p10 = pnand %p2267_p9, %p2264_p8 }
  0x20   :  { %2272 = shalt.err (!%p2269_p10)
}
  0x21   :  { %s2273_s1 = scalar_lea.vmem %s72_s28, 16  ;;  %s2277_s30 = scalar_lea.vmem %s72_s28, 32 }
  0x22   :  { %p2274_p11 = scmp.ne.s32.totalorder %s72_s28, %s2273_s1  ;;  %p2278_p12 = scmp.lt.s32.totalorder %s72_s28, %s72_s28 }
  0x23   :  { %p2279_p13 = scmp.lt.s32.totalorder %s2277_s30, %s2273_s1 }
  0x25   :  { %p2280_p0 = por %p2279_p13, %p2278_p12 }
  0x27   :  { %p2281_p1 = pnand %p2280_p0, %p2274_p11 }
  0x29   :  { %2284 = shalt.err (!%p2281_p1)
}
  0x2a   :  { %74 = dma.hbm_to_vmem [thread:$0]  %s3176_s3, 16, %s72_s28, [#allocation9]  }
  0x2b   :  { %s2285_s16 = scalar_lea.hbm %s3178_s5, 16 }
  0x2c   :  { %p2286_p2 = scmp.ne.s32.totalorder %s3178_s5, %s2285_s16  ;;  %p2289_p3 = scmp.lt.u32.totalorder %s2285_s16, %s3178_s5 }
  0x2e   :  { %p2291_p4 = pnand %p2289_p3, %p2286_p2 }
  0x30   :  { %2294 = shalt.err (!%p2291_p4)
}
  0x31   :  { %s2295_s21 = scalar_lea.vmem %s92_s15, 16  ;;  %s2299_s22 = scalar_lea.vmem %s92_s15, 32 }
  0x32   :  { %p2296_p5 = scmp.ne.s32.totalorder %s92_s15, %s2295_s21  ;;  %p2300_p6 = scmp.lt.s32.totalorder %s92_s15, %s92_s15 }
  0x33   :  { %p2301_p7 = scmp.lt.s32.totalorder %s2299_s22, %s2295_s21 }
  0x35   :  { %p2302_p8 = por %p2301_p7, %p2300_p6 }
  0x37   :  { %p2303_p9 = pnand %p2302_p8, %p2296_p5 }
  0x39   :  { %2306 = shalt.err (!%p2303_p9)
}
  0x3a   :  { %94 = dma.hbm_to_vmem [thread:$0]  %s3178_s5, 16, %s92_s15, [#allocation12]  }
  0x3b   :  { %s2594_s1 = smov [#allocation14]   ;;  %s2595_s25 = smov [#allocation17]  }
  0x3c   :  { %s111_s30 = sshll.u32 %s2594_s1, 4  ;;  %s133_s26 = sshll.u32 %s2595_s25, 4  ;;  %s112_s30 = int_to_ptr.vmem [resolvable:$true] %s111_s30  ;;  %s134_s26 = int_to_ptr.vmem [resolvable:$true] %s133_s26 }
  0x3d   :  { %s2307_s16 = scalar_lea.hbm %s3180_s7, 16 }
  0x3e   :  { %p2308_p10 = scmp.ne.s32.totalorder %s3180_s7, %s2307_s16  ;;  %p2311_p11 = scmp.lt.u32.totalorder %s2307_s16, %s3180_s7 }
  0x40   :  { %p2313_p12 = pnand %p2311_p11, %p2308_p10 }
  0x42   :  { %2316 = shalt.err (!%p2313_p12)
}
  0x43   :  { %s2317_s5 = scalar_lea.vmem %s112_s30, 16  ;;  %s2321_s15 = scalar_lea.vmem %s112_s30, 32 }
  0x44   :  { %p2318_p13 = scmp.ne.s32.totalorder %s112_s30, %s2317_s5  ;;  %p2322_p0 = scmp.lt.s32.totalorder %s112_s30, %s112_s30 }
  0x45   :  { %p2323_p1 = scmp.lt.s32.totalorder %s2321_s15, %s2317_s5 }
  0x47   :  { %p2324_p2 = por %p2323_p1, %p2322_p0 }
  0x49   :  { %p2325_p3 = pnand %p2324_p2, %p2318_p13 }
  0x4b   :  { %2328 = shalt.err (!%p2325_p3)
}
  0x4c   :  { %114 = dma.hbm_to_vmem [thread:$0]  %s3180_s7, 16, %s112_s30, [#allocation15]  }
  0x4d   :  { %s2329_s1 = scalar_lea.hbm %s3182_s9, 16 }
  0x4e   :  { %p2330_p4 = scmp.ne.s32.totalorder %s3182_s9, %s2329_s1  ;;  %p2333_p5 = scmp.lt.u32.totalorder %s2329_s1, %s3182_s9 }
  0x50   :  { %p2335_p6 = pnand %p2333_p5, %p2330_p4 }
  0x52   :  { %2338 = shalt.err (!%p2335_p6)
}
  0x53   :  { %s2339_s17 = scalar_lea.vmem %s134_s26, 16  ;;  %s2343_s18 = scalar_lea.vmem %s134_s26, 32 }
  0x54   :  { %p2340_p7 = scmp.ne.s32.totalorder %s134_s26, %s2339_s17  ;;  %p2344_p8 = scmp.lt.s32.totalorder %s134_s26, %s134_s26 }
  0x55   :  { %p2345_p9 = scmp.lt.s32.totalorder %s2343_s18, %s2339_s17 }
  0x57   :  { %p2346_p10 = por %p2345_p9, %p2344_p8 }
  0x59   :  { %p2347_p11 = pnand %p2346_p10, %p2340_p7 }
  0x5b   :  { %2350 = shalt.err (!%p2347_p11)
}
  0x5c   :  { %136 = dma.hbm_to_vmem [thread:$0]  %s3182_s9, 16, %s134_s26, [#allocation18]  }
  0x5d   :  { %s2596_s19 = smov [#allocation20]   ;;  %s2597_s5 = smov [#allocation2]  }
  0x5e   :  { %s155_s20 = sshll.u32 %s2596_s19, 4  ;;  %s34_s15 = sshll.u32 %s2597_s5, 4  ;;  %s156_s20 = int_to_ptr.vmem [resolvable:$true] %s155_s20  ;;  %s35_s15 = int_to_ptr.vmem [resolvable:$true] %s34_s15 }
  0x5f   :  { %s2351_s3 = scalar_lea.hbm %s3184_s11, 16 }
  0x60   :  { %p2352_p12 = scmp.ne.s32.totalorder %s3184_s11, %s2351_s3  ;;  %p2355_p13 = scmp.lt.u32.totalorder %s2351_s3, %s3184_s11 }
  0x62   :  { %p2357_p0 = pnand %p2355_p13, %p2352_p12 }
  0x64   :  { %2360 = shalt.err (!%p2357_p0)
}
  0x65   :  { %s2361_s9 = scalar_lea.vmem %s156_s20, 16  ;;  %s2365_s26 = scalar_lea.vmem %s156_s20, 32 }
  0x66   :  { %p2362_p1 = scmp.ne.s32.totalorder %s156_s20, %s2361_s9  ;;  %p2366_p2 = scmp.lt.s32.totalorder %s156_s20, %s156_s20 }
  0x67   :  { %p2367_p3 = scmp.lt.s32.totalorder %s2365_s26, %s2361_s9 }
  0x69   :  { %p2368_p4 = por %p2367_p3, %p2366_p2 }
  0x6b   :  { %p2369_p5 = pnand %p2368_p4, %p2362_p1 }
  0x6d   :  { %2372 = shalt.err (!%p2369_p5)
}
  0x6e   :  { %158 = dma.hbm_to_vmem [thread:$0]  %s3184_s11, 16, %s156_s20, [#allocation21]  }
  0x6f   :  { %s2373_s7 = scalar_lea.hbm %s3173_s0, 256 }
  0x70   :  { %p2374_p6 = scmp.ne.s32.totalorder %s3173_s0, %s2373_s7  ;;  %p2377_p7 = scmp.lt.u32.totalorder %s2373_s7, %s3173_s0 }
  0x72   :  { %p2379_p8 = pnand %p2377_p7, %p2374_p6 }
  0x74   :  { %2382 = shalt.err (!%p2379_p8)
}
  0x75   :  { %s2383_s22 = scalar_lea.vmem %s35_s15, 256  ;;  %p2388_p10 = scmp.lt.s32.totalorder %s35_s15, %s35_s15 }
  0x76   :  { %p2384_p9 = scmp.ne.s32.totalorder %s35_s15, %s2383_s22  ;;  %p2389_p11 = scmp.lt.s32.totalorder %s2383_s22, %s2383_s22 }
  0x78   :  { %p2390_p12 = por %p2389_p11, %p2388_p10 }
  0x7a   :  { %p2391_p13 = pnand %p2390_p12, %p2384_p9 }
  0x7c   :  { %2394 = shalt.err (!%p2391_p13)
}
  0x7d   :  { %s2598_s11 = smov 128   ;;  %s2599_s20 = smov 8  }
  0x7e   :  { %40 = dma.hbm_to_vmem [thread:$0]  %s3173_s0, 256, %s35_s15, [#allocation3], %s2598_s11, %s2598_s11, %s2599_s20  }
  0x7f   :  { %s2600_s1 = smov [#allocation7]   ;;  %s2601_s27 = smov [#allocation10]  }
  0x80   :  { %s58_s25 = sshll.u32 %s2600_s1, 4  ;;  %s81_s9 = sshll.u32 %s2601_s27, 4  ;;  %s59_s25 = int_to_ptr.vmem [resolvable:$true] %s58_s25  ;;  %s82_s9 = int_to_ptr.vmem [resolvable:$true] %s81_s9 }
  0x81   :  { %s2395_s16 = scalar_lea.hbm %s3175_s2, 512 }
  0x82   :  { %p2396_p0 = scmp.ne.s32.totalorder %s3175_s2, %s2395_s16  ;;  %p2399_p1 = scmp.lt.u32.totalorder %s2395_s16, %s3175_s2 }
  0x84   :  { %p2401_p2 = pnand %p2399_p1, %p2396_p0 }
  0x86   :  { %2404 = shalt.err (!%p2401_p2)
}
  0x87   :  { %s2405_s0 = scalar_lea.vmem %s59_s25, 512  ;;  %p2410_p4 = scmp.lt.s32.totalorder %s59_s25, %s59_s25 }
  0x88   :  { %p2406_p3 = scmp.ne.s32.totalorder %s59_s25, %s2405_s0  ;;  %p2411_p5 = scmp.lt.s32.totalorder %s2405_s0, %s2405_s0 }
  0x8a   :  { %p2412_p6 = por %p2411_p5, %p2410_p4 }
  0x8c   :  { %p2413_p7 = pnand %p2412_p6, %p2406_p3 }
  0x8e   :  { %2416 = shalt.err (!%p2413_p7)
}
  0x8f   :  { %64 = dma.hbm_to_vmem [thread:$0]  %s3175_s2, 512, %s59_s25, [#allocation6], %s2590_s23, %s2590_s23, %s2591_s24  }
  0x90   :  { %s2417_s22 = scalar_lea.hbm %s3177_s4, 16 }
  0x91   :  { %p2418_p8 = scmp.ne.s32.totalorder %s3177_s4, %s2417_s22  ;;  %p2421_p9 = scmp.lt.u32.totalorder %s2417_s22, %s3177_s4 }
  0x93   :  { %p2423_p10 = pnand %p2421_p9, %p2418_p8 }
  0x95   :  { %2426 = shalt.err (!%p2423_p10)
}
  0x96   :  { %s2427_s26 = scalar_lea.vmem %s82_s9, 16  ;;  %s2431_s29 = scalar_lea.vmem %s82_s9, 32 }
  0x97   :  { %p2428_p11 = scmp.ne.s32.totalorder %s82_s9, %s2427_s26  ;;  %p2432_p12 = scmp.lt.s32.totalorder %s82_s9, %s82_s9 }
  0x98   :  { %p2433_p13 = scmp.lt.s32.totalorder %s2431_s29, %s2427_s26 }
  0x9a   :  { %p2434_p0 = por %p2433_p13, %p2432_p12 }
  0x9c   :  { %p2435_p1 = pnand %p2434_p0, %p2428_p11 }
  0x9e   :  { %2438 = shalt.err (!%p2435_p1)
}
  0x9f   :  { %84 = dma.hbm_to_vmem [thread:$0]  %s3177_s4, 16, %s82_s9, [#allocation9]  }
  0xa0   :  { %s2602_s16 = smov [#allocation13]   ;;  %s2603_s18 = smov [#allocation16]  }
  0xa1   :  { %s101_s17 = sshll.u32 %s2602_s16, 4  ;;  %s120_s7 = sshll.u32 %s2603_s18, 4  ;;  %s102_s17 = int_to_ptr.vmem [resolvable:$true] %s101_s17  ;;  %s121_s7 = int_to_ptr.vmem [resolvable:$true] %s120_s7 }
  0xa2   :  { %s2439_s15 = scalar_lea.hbm %s3179_s6, 16 }
  0xa3   :  { %p2440_p2 = scmp.ne.s32.totalorder %s3179_s6, %s2439_s15  ;;  %p2443_p3 = scmp.lt.u32.totalorder %s2439_s15, %s3179_s6 }
  0xa5   :  { %p2445_p4 = pnand %p2443_p3, %p2440_p2 }
  0xa7   :  { %2448 = shalt.err (!%p2445_p4)
}
  0xa8   :  { %s2449_s4 = scalar_lea.vmem %s102_s17, 16  ;;  %s2453_s9 = scalar_lea.vmem %s102_s17, 32 }
  0xa9   :  { %p2450_p5 = scmp.ne.s32.totalorder %s102_s17, %s2449_s4  ;;  %p2454_p6 = scmp.lt.s32.totalorder %s102_s17, %s102_s17 }
  0xaa   :  { %p2455_p7 = scmp.lt.s32.totalorder %s2453_s9, %s2449_s4 }
  0xac   :  { %p2456_p8 = por %p2455_p7, %p2454_p6 }
  0xae   :  { %p2457_p9 = pnand %p2456_p8, %p2450_p5 }
  0xb0   :  { %2460 = shalt.err (!%p2457_p9)
}
  0xb1   :  { %104 = dma.hbm_to_vmem [thread:$0]  %s3179_s6, 16, %s102_s17, [#allocation12]  }
  0xb2   :  { %s2461_s26 = scalar_lea.hbm %s3181_s8, 256 }
  0xb3   :  { %p2462_p10 = scmp.ne.s32.totalorder %s3181_s8, %s2461_s26  ;;  %p2465_p11 = scmp.lt.u32.totalorder %s2461_s26, %s3181_s8 }
  0xb5   :  { %p2467_p12 = pnand %p2465_p11, %p2462_p10 }
  0xb7   :  { %2470 = shalt.err (!%p2467_p12)
}
  0xb8   :  { %s2471_s18 = scalar_lea.vmem %s121_s7, 256  ;;  %p2476_p0 = scmp.lt.s32.totalorder %s121_s7, %s121_s7 }
  0xb9   :  { %p2472_p13 = scmp.ne.s32.totalorder %s121_s7, %s2471_s18  ;;  %p2477_p1 = scmp.lt.s32.totalorder %s2471_s18, %s2471_s18 }
  0xbb   :  { %p2478_p2 = por %p2477_p1, %p2476_p0 }
  0xbd   :  { %p2479_p3 = pnand %p2478_p2, %p2472_p13 }
  0xbf   :  { %2482 = shalt.err (!%p2479_p3)
}
  0xc0   :  { %126 = dma.hbm_to_vmem [thread:$0]  %s3181_s8, 256, %s121_s7, [#allocation15], %s2590_s23, %s2590_s23, %s2591_s24  }
  0xc1   :  { %s2604_s30 = smov [#allocation19]   ;;  %s2605_s15 = smov [#allocation22]  }
  0xc2   :  { %s142_s0 = sshll.u32 %s2604_s30, 4  ;;  %s165_s19 = sshll.u32 %s2605_s15, 4  ;;  %s143_s0 = int_to_ptr.vmem [resolvable:$true] %s142_s0  ;;  %s166_s19 = int_to_ptr.vmem [resolvable:$true] %s165_s19 }
  0xc3   :  { %s2483_s22 = scalar_lea.hbm %s3183_s10, 512 }
  0xc4   :  { %p2484_p4 = scmp.ne.s32.totalorder %s3183_s10, %s2483_s22  ;;  %p2487_p5 = scmp.lt.u32.totalorder %s2483_s22, %s3183_s10 }
  0xc6   :  { %p2489_p6 = pnand %p2487_p5, %p2484_p4 }
  0xc8   :  { %2492 = shalt.err (!%p2489_p6)
}
  0xc9   :  { %s2493_s8 = scalar_lea.vmem %s143_s0, 512  ;;  %p2498_p8 = scmp.lt.s32.totalorder %s143_s0, %s143_s0 }
  0xca   :  { %p2494_p7 = scmp.ne.s32.totalorder %s143_s0, %s2493_s8  ;;  %p2499_p9 = scmp.lt.s32.totalorder %s2493_s8, %s2493_s8 }
  0xcc   :  { %p2500_p10 = por %p2499_p9, %p2498_p8 }
  0xce   :  { %p2501_p11 = pnand %p2500_p10, %p2494_p7 }
  0xd0   :  { %2504 = shalt.err (!%p2501_p11)
}
  0xd1   :  { %148 = dma.hbm_to_vmem [thread:$0]  %s3183_s10, 512, %s143_s0, [#allocation18], %s2590_s23, %s2590_s23, %s2591_s24  }
  0xd2   :  { %s2505_s29 = scalar_lea.hbm %s3185_s12, 128 }
  0xd3   :  { %p2506_p12 = scmp.ne.s32.totalorder %s3185_s12, %s2505_s29  ;;  %p2509_p13 = scmp.lt.u32.totalorder %s2505_s29, %s3185_s12 }
  0xd5   :  { %p2511_p0 = pnand %p2509_p13, %p2506_p12 }
  0xd7   :  { %2514 = shalt.err (!%p2511_p0)
}
  0xd8   :  { %s2515_s6 = scalar_lea.vmem %s166_s19, 128  ;;  %p2520_p2 = scmp.lt.s32.totalorder %s166_s19, %s166_s19 }
  0xd9   :  { %p2516_p1 = scmp.ne.s32.totalorder %s166_s19, %s2515_s6  ;;  %p2521_p3 = scmp.lt.s32.totalorder %s2515_s6, %s2515_s6 }
  0xdb   :  { %p2522_p4 = por %p2521_p3, %p2520_p2 }
  0xdd   :  { %p2523_p5 = pnand %p2522_p4, %p2516_p1 }
  0xdf   :  { %2526 = shalt.err (!%p2523_p5)
}
  0xe0   :  { %168 = dma.hbm_to_vmem [thread:$0]  %s3185_s12, 128, %s166_s19, [#allocation21]  }
  0xe1   :  { %2571 = dma.done.wait [#allocation3], 256  }
  0xe2   :  { %2572 = vsyncadd [#allocation3], 4294967040 }
  0xe3   :  { %2573 = dma.done.wait [#allocation6], 768  }
  0xe4   :  { %2574 = vsyncadd [#allocation6], 4294966528 }
  0xe5   :  { %2575 = dma.done.wait [#allocation9], 32  }
  0xe6   :  { %2576 = vsyncadd [#allocation9], 4294967264 }
  0xe7   :  { %2577 = dma.done.wait [#allocation12], 32  }
  0xe8   :  { %2578 = vsyncadd [#allocation12], 4294967264 }
  0xe9   :  { %2579 = dma.done.wait [#allocation15], 272  }
  0xea   :  { %2580 = vsyncadd [#allocation15], 4294967024 }
  0xeb   :  { %2581 = dma.done.wait [#allocation18], 528  }
  0xec   :  { %2582 = vsyncadd [#allocation18], 4294966768 }
  0xed   :  { %2583 = dma.done.wait [#allocation21], 144  }
  0xee   :  { %2584 = vsyncadd [#allocation21], 4294967152  ;;  %vm213_vm0 = vcmask 261120   ;;  %v209_v0 = vld [vmem:[#allocation2] sm:$0xff]  ;;  %v210_v1 = vld [vmem:[#allocation2 + $0x8] sm:$0xff]  ;;  %v2606_v15 = vmov 0.0  }
  0xef   :  { %v214_v2 = vsel %vm213_vm0, %v209_v0, 0.0  ;;  %v217_v3 = vsel %vm213_vm0, %v210_v1, 0.0  ;;  %v2193_v14 = vld [vmem:[#allocation5] sm:$0xff]   ;;  %1981 = vmatprep.subr.bf16.mxu1 %v2606_v15  ;;  %1995 = vmatprep.subr.bf16.mxu0 %v2606_v15  ;;  %v2194_v16 = vld [vmem:[#allocation5 + $0x8] sm:$0xff]   ;;  %vm2607_vm1 = vmmov 0   ;;  %s2608_s12 = smov 112  }
  0xf0   :  { %215 = vadd.xlane.f32.xlu0 %v214_v2  ;;  %1982 = vmatpush3.bf16.msra.mxu1 %v2193_v14  ;;  %v1880_v25 = vld [vmem:[#allocation10] ss:$0 sm:$0xff]  ;;  %v1881_v29 = vld [vmem:[#allocation11] ss:$0 sm:$0xff]  ;;  %s2609_s17 = smov 120   ;;  %s2610_s30 = smov 104  }
  0xf1   :  { %1985 = vmatprep.mubr.msk.bf16.mxu1 %vm2607_vm1, %v2606_v15  ;;  %1983 = vmatprep.subr.bf16.mxu1 %v2606_v15  ;;  %s2611_s0 = smov 96   ;;  %vm350_vm2 = vcmask 64512   ;;  %vm849_vm3 = vcmask 1043456   ;;  %vm1792_vm4 = vcmask 523264  }
  0xf2   :  { %1997 = vmatprep.mubr.msk.bf16.mxu0 %vm2607_vm1, %v2606_v15 }
  0xf4   :  { %218 = vadd.xlane.f32.xlu0 %v217_v3  ;;  %1984 = vmatpush3.bf16.msra.mxu1 %v2194_v16 }
  0xf5   :  { %1989 = vmatprep.subr.bf16.mxu1 %v2606_v15 }
 0x17d   :  { %v216_v4 = vpop.xlane.xlu0 %215 }
 0x17e   :  { %v221_v5 = vmul.f32 0.03125, %v216_v4 }
 0x180   :  { %v223_v6 = vsub.f32 %v209_v0, %v221_v5 }
 0x181   :  { %v219_v7 = vpop.xlane.xlu0 %218 }
 0x182   :  { %v222_v8 = vmul.f32 0.03125, %v219_v7  ;;  %v225_v9 = vmul.f32 %v223_v6, %v223_v6 }
 0x184   :  { %v224_v10 = vsub.f32 %v210_v1, %v222_v8  ;;  %v227_v11 = vsel %vm213_vm0, %v225_v9, 0.0 }
 0x185   :  { %228 = vadd.xlane.f32.xlu1 %v227_v11 }
 0x186   :  { %v226_v12 = vmul.f32 %v224_v10, %v224_v10 }
 0x188   :  { %v230_v13 = vsel %vm213_vm0, %v226_v12, 0.0 }
 0x189   :  { %231 = vadd.xlane.f32.xlu1 %v230_v13 }
 0x212   :  { %v229_v17 = vpop.xlane.xlu1 %228 }
 0x213   :  { %v233_v18 = vmul.f32 0.03125, %v229_v17 }
 0x215   :  { %v235_v19 = vadd.f32 1e-05, %v233_v18 }
 0x216   :  { %v232_v20 = vpop.xlane.xlu1 %231 }
 0x217   :  { %2201 = vrsqrt.f32 %v235_v19  ;;  %v234_v21 = vmul.f32 0.03125, %v232_v20 }
 0x219   :  { %v236_v22 = vadd.f32 1e-05, %v234_v21 }
 0x21b   :  { %2203 = vrsqrt.f32 %v236_v22 }
 0x221   :  { %v2202_v23 = vpop.eup %2201 }
 0x222   :  { %v239_v24 = vmul.f32 %v2202_v23, %v223_v6 }
 0x224   :  { %v247_v28 = vmul.f32 %v1880_v25, %v239_v24 }
 0x225   :  { %v2204_v26 = vpop.eup %2203 }
 0x226   :  { %v240_v27 = vmul.f32 %v2204_v26, %v224_v10  ;;  %v2872_v31 = vadd.f32 %v1881_v29, %v247_v28  ;;  %v346_v10 = vld [vmem:[#allocation22] sm:$0xff] }
 0x228   :  { %v248_v30 = vmul.f32 %v1880_v25, %v240_v27 }
 0x22a   :  { %v2874_v32 = vadd.f32 %v1881_v29, %v248_v30 }
 0x22c   :  { %v257_v33 = vpack.c.bf16 %v2874_v32, %v2872_v31 }
 0x22e   :  { %1986 = vmatmul.mubr.msk.bf16.vlgmr.msra.gmra.mrb[0].mxu1 %vm213_vm0, %v257_v33 }
 0x22f   :  { %1991 = vmatprep.mubr.msk.bf16.mxu1 %vm2607_vm1, %v2606_v15 }
 0x301   :  { %v311_v34 = vpop.f32.mrb[0].mxu1 }
 0x302   :  { %v1987_v35 = vpop.f32.mrb[1].mxu1  ;;  %v338_v40 = vpack.c.bf16 %v311_v34, %v311_v34 }
 0x303   :  { %v314_v36 = vpop.f32.mrb[2].mxu1 }
 0x304   :  { %v1988_v37 = vpop.f32.mrb[3].mxu1  ;;  %v2183_v38 = vpack.i.bf16 %v314_v36, %v311_v34  ;;  %v2881_v39 = vpack.c.bf16 %v314_v36, %v314_v36 }
 0x306   :  { %2184 = vrot.lane.b32.xlu1 %v2183_v38, %s2608_s12  ;;  %2179 = vrot.lane.b32.xlu0 %v2183_v38, %s2609_s17 }
 0x30a   :  { %2189 = vrot.lane.b32.xlu1 %v2183_v38, %s2610_s30  ;;  %398 = vrot.lane.b32.xlu0 %v2881_v39, %s2611_s0 }
 0x30e   :  { %348 = vrot.lane.b32.xlu1 %v338_v40, %s2611_s0 }
 0x378   :  { %v2185_v41 = vpop.permute.xlu1 %2184  ;;  %v2180_v42 = vpop.permute.xlu0 %2179 }
 0x379   :  { %v2182_v43 = vunpack.i.h.bf16 %v2180_v42  ;;  %v2181_v44 = vunpack.i.l.bf16 %v2180_v42  ;;  %v2187_v45 = vunpack.i.h.bf16 %v2185_v41  ;;  %v2186_v46 = vunpack.i.l.bf16 %v2185_v41 }
 0x37b   :  { %v2886_v47 = vpack.c.bf16 %v2182_v43, %v2182_v43  ;;  %v2888_v48 = vpack.c.bf16 %v2181_v44, %v2181_v44  ;;  %v2895_v52 = vpack.c.bf16 %v2187_v45, %v2187_v45  ;;  %v2897_v53 = vpack.c.bf16 %v2186_v46, %v2186_v46 }
 0x37c   :  { %v2190_v49 = vpop.permute.xlu1 %2189  ;;  %v399_v50 = vpop.permute.xlu0 %398 }
 0x37d   :  { %447 = vrot.lane.b32.xlu1 %v2888_v48, %s2611_s0  ;;  %496 = vrot.lane.b32.xlu0 %v2886_v47, %s2611_s0  ;;  %v404_v51 = vsel %vm350_vm2, %v399_v50, 0  ;;  %v2192_v54 = vunpack.i.h.bf16 %v2190_v49  ;;  %v2191_v55 = vunpack.i.l.bf16 %v2190_v49 }
 0x37e   :  { %1996 = vmatpush3.bf16.xpose.msra.mxu0 %v404_v51 }
 0x37f   :  { %2007 = vmatprep.subr.bf16.mxu0 %v2606_v15  ;;  %v2905_v58 = vpack.c.bf16 %v2192_v54, %v2192_v54  ;;  %v2907_v59 = vpack.c.bf16 %v2191_v55, %v2191_v55 }
 0x380   :  { %v349_v56 = vpop.permute.xlu1 %348 }
 0x381   :  { %v355_v57 = vsel %vm350_vm2, %v349_v56, 0  ;;  %545 = vrot.lane.b32.xlu1 %v2897_v53, %s2611_s0  ;;  %594 = vrot.lane.b32.xlu0 %v2895_v52, %s2611_s0 }
 0x382   :  { %1990 = vmatpush3.bf16.xpose.msra.mxu1 %v355_v57 }
 0x383   :  { %2001 = vmatprep.subr.bf16.mxu1 %v2606_v15 }
 0x385   :  { %643 = vrot.lane.b32.xlu1 %v2907_v59, %s2611_s0  ;;  %692 = vrot.lane.b32.xlu0 %v2905_v58, %s2611_s0 }
 0x386   :  { %1998 = vmatmul.mubr.msk.bf16.vlgmr.msra.gmra.mrb[0].mxu0 %vm350_vm2, %v2881_v39 }
 0x387   :  { %2009 = vmatprep.mubr.msk.bf16.mxu0 %vm2607_vm1, %v2606_v15 }
 0x389   :  { %1992 = vmatmul.mubr.msk.bf16.vlgmr.msra.gmra.mrb[4].mxu1 %vm350_vm2, %v338_v40  ;;  %844 = vrot.lane.b32.xlu1 %v338_v40, %s2590_s23 }
 0x38a   :  { %2003 = vmatprep.mubr.msk.bf16.mxu1 %vm2607_vm1, %v2606_v15 }
 0x3ef   :  { %v448_v60 = vpop.permute.xlu1 %447  ;;  %v497_v61 = vpop.permute.xlu0 %496 }
 0x3f0   :  { %v453_v62 = vsel %vm350_vm2, %v448_v60, 0  ;;  %v502_v63 = vsel %vm350_vm2, %v497_v61, 0 }
 0x3f1   :  { %2002 = vmatpush3.bf16.xpose.msra.mxu1 %v453_v62  ;;  %2008 = vmatpush3.bf16.xpose.msra.mxu0 %v502_v63 }
 0x3f2   :  { %2013 = vmatprep.subr.bf16.mxu1 %v2606_v15  ;;  %2019 = vmatprep.subr.bf16.mxu0 %v2606_v15 }
 0x3f3   :  { %v546_v0 = vpop.permute.xlu1 %545  ;;  %v595_v1 = vpop.permute.xlu0 %594 }
 0x3f4   :  { %v551_v2 = vsel %vm350_vm2, %v546_v0, 0  ;;  %v600_v3 = vsel %vm350_vm2, %v595_v1, 0 }
 0x3f7   :  { %v644_v4 = vpop.permute.xlu1 %643  ;;  %v693_v5 = vpop.permute.xlu0 %692 }
 0x3f8   :  { %2004 = vmatmul.mubr.msk.bf16.vlgmr.msra.gmra.mrb[8].mxu1 %vm350_vm2, %v2888_v48  ;;  %2010 = vmatmul.mubr.msk.bf16.vlgmr.msra.gmra.mrb[4].mxu0 %vm350_vm2, %v2886_v47  ;;  %v649_v6 = vsel %vm350_vm2, %v644_v4, 0  ;;  %v698_v7 = vsel %vm350_vm2, %v693_v5, 0 }
 0x3f9   :  { %2014 = vmatpush3.bf16.xpose.msra.mxu1 %v551_v2  ;;  %2020 = vmatpush3.bf16.xpose.msra.mxu0 %v600_v3 }
 0x3fa   :  { %2015 = vmatprep.mubr.msk.bf16.mxu1 %vm2607_vm1, %v2606_v15  ;;  %2021 = vmatprep.mubr.msk.bf16.mxu0 %vm2607_vm1, %v2606_v15 }
 0x3fb   :  { %2025 = vmatprep.subr.bf16.mxu1 %v2606_v15  ;;  %2031 = vmatprep.subr.bf16.mxu0 %v2606_v15  ;;  %v845_v8 = vpop.permute.xlu1 %844 }
 0x3fc   :  { %v851_v9 = vsel %vm849_vm3, %v845_v8, 0 }
 0x400   :  { %2016 = vmatmul.mubr.msk.bf16.vlgmr.msra.gmra.mrb[12].mxu1 %vm350_vm2, %v2897_v53  ;;  %2022 = vmatmul.mubr.msk.bf16.vlgmr.msra.gmra.mrb[8].mxu0 %vm350_vm2, %v2895_v52 }
 0x401   :  { %2026 = vmatpush3.bf16.xpose.msra.mxu1 %v649_v6  ;;  %2032 = vmatpush3.bf16.xpose.msra.mxu0 %v698_v7 }
 0x402   :  { %2027 = vmatprep.mubr.msk.bf16.mxu1 %vm2607_vm1, %v2606_v15  ;;  %2033 = vmatprep.mubr.msk.bf16.mxu0 %vm2607_vm1, %v2606_v15 }
 0x403   :  { %2037 = vmatprep.subr.bf16.mxu1 %v2606_v15  ;;  %2043 = vmatprep.subr.bf16.mxu0 %v2606_v15 }
 0x408   :  { %2028 = vmatmul.mubr.msk.bf16.vlgmr.msra.gmra.mrb[16].mxu1 %vm350_vm2, %v2907_v59  ;;  %2034 = vmatmul.mubr.msk.bf16.vlgmr.msra.gmra.mrb[12].mxu0 %vm350_vm2, %v2905_v58 }
 0x409   :  { %2038 = vmatpush3.bf16.msra.mxu1 %v851_v9  ;;  %2045 = vmatprep.mubr.msk.bf16.mxu0 %vm2607_vm1, %v2606_v15 }
 0x40a   :  { %2039 = vmatprep.mubr.msk.bf16.mxu1 %vm2607_vm1, %v2606_v15  ;;  %2049 = vmatprep.subr.bf16.mxu1 %v2606_v15 }
 0x459   :  { %v440_v11 = vpop.f32.mrb[0].mxu0 }
 0x45a   :  { %v441_v12 = vadd.f32 %v440_v11, %v346_v10  ;;  %v1999_v13 = vpop.f32.mrb[1].mxu0 }
 0x45b   :  { %v443_v14 = vpop.f32.mrb[2].mxu0 }
 0x45c   :  { %v2000_v16 = vpop.f32.mrb[3].mxu0  ;;  %v743_v17 = vsel %vm350_vm2, %v441_v12, -inf  ;;  %v391_v18 = vpop.f32.mrb[4].mxu1 }
 0x45d   :  { %744 = vmax.xlane.f32.xlu0 %v743_v17  ;;  %v392_v19 = vadd.f32 %v391_v18, %v346_v10  ;;  %v1993_v20 = vpop.f32.mrb[5].mxu1 }
 0x45e   :  { %v394_v21 = vpop.f32.mrb[6].mxu1 }
 0x45f   :  { %v1994_v22 = vpop.f32.mrb[7].mxu1  ;;  %v740_v23 = vsel %vm350_vm2, %v392_v19, -inf }
 0x460   :  { %741 = vmax.xlane.f32.xlu1 %v740_v23 }
 0x4cb   :  { %v489_v24 = vpop.f32.mrb[8].mxu1  ;;  %v538_v25 = vpop.f32.mrb[4].mxu0 }
 0x4cc   :  { %v490_v26 = vadd.f32 %v489_v24, %v346_v10  ;;  %v2005_v27 = vpop.f32.mrb[9].mxu1  ;;  %v2011_v28 = vpop.f32.mrb[5].mxu0  ;;  %v539_v33 = vadd.f32 %v538_v25, %v346_v10 }
 0x4cd   :  { %v492_v29 = vpop.f32.mrb[10].mxu1  ;;  %v541_v30 = vpop.f32.mrb[6].mxu0 }
 0x4ce   :  { %v2006_v34 = vpop.f32.mrb[11].mxu1  ;;  %v2012_v35 = vpop.f32.mrb[7].mxu0  ;;  %v746_v36 = vsel %vm350_vm2, %v490_v26, -inf  ;;  %v749_v37 = vsel %vm350_vm2, %v539_v33, -inf }
 0x4cf   :  { %747 = vmax.xlane.f32.xlu0 %v746_v36 }
 0x4d3   :  { %v636_v38 = vpop.f32.mrb[8].mxu0  ;;  %750 = vmax.xlane.f32.xlu0 %v749_v37  ;;  %v587_v40 = vpop.f32.mrb[12].mxu1 }
 0x4d4   :  { %v2964_v41 = vadd.f32 %v636_v38, %v346_v10  ;;  %v588_v42 = vadd.f32 %v587_v40, %v346_v10  ;;  %v2017_v43 = vpop.f32.mrb[13].mxu1  ;;  %v2023_v44 = vpop.f32.mrb[9].mxu0 }
 0x4d5   :  { %v590_v45 = vpop.f32.mrb[14].mxu1  ;;  %v639_v46 = vpop.f32.mrb[10].mxu0 }
 0x4d6   :  { %v2018_v49 = vpop.f32.mrb[15].mxu1  ;;  %v2024_v50 = vpop.f32.mrb[11].mxu0  ;;  %v755_v51 = vsel %vm350_vm2, %v2964_v41, -inf  ;;  %v752_v54 = vsel %vm350_vm2, %v588_v42, -inf }
 0x4d7   :  { %756 = vmax.xlane.f32.xlu0 %v755_v51  ;;  %753 = vmax.xlane.f32.xlu1 %v752_v54 }
 0x4db   :  { %v685_v55 = vpop.f32.mrb[16].mxu1  ;;  %v734_v56 = vpop.f32.mrb[12].mxu0 }
 0x4dc   :  { %v686_v57 = vadd.f32 %v685_v55, %v346_v10  ;;  %v2969_v60 = vadd.f32 %v734_v56, %v346_v10  ;;  %v2029_v61 = vpop.f32.mrb[17].mxu1  ;;  %v2035_v62 = vpop.f32.mrb[13].mxu0 }
 0x4dd   :  { %v688_v63 = vpop.f32.mrb[18].mxu1  ;;  %v737_v0 = vpop.f32.mrb[14].mxu0 }
 0x4de   :  { %v2030_v1 = vpop.f32.mrb[19].mxu1  ;;  %v2036_v2 = vpop.f32.mrb[15].mxu0  ;;  %v761_v3 = vsel %vm350_vm2, %v2969_v60, -inf  ;;  %v758_v4 = vsel %vm350_vm2, %v686_v57, -inf }
 0x4df   :  { %762 = vmax.xlane.f32.xlu0 %v761_v3  ;;  %759 = vmax.xlane.f32.xlu1 %v758_v4 }
 0x4ea   :  { %v745_v5 = vpop.xlane.xlu0 %744 }
 0x4eb   :  { %v765_v6 = vsub.f32 %v441_v12, %v745_v5 }
 0x4ed   :  { %v742_v7 = vpop.xlane.xlu1 %741  ;;  %v774_v8 = vmul.f32 1.442695, %v765_v6 }
 0x4ee   :  { %v764_v9 = vsub.f32 %v392_v19, %v742_v7 }
 0x4ef   :  { %2205 = vpow2.f32 %v774_v8 }
 0x4f0   :  { %941 = vrot.lane.b32.xlu1 %v2888_v48, %s2590_s23  ;;  %v772_v10 = vmul.f32 1.442695, %v764_v9 }
 0x4f2   :  { %2207 = vpow2.f32 %v772_v10 }
 0x4f4   :  { %989 = vrot.lane.b32.xlu1 %v2886_v47, %s2590_s23 }
 0x4f5   :  { %893 = vrot.lane.b32.xlu0 %v2881_v39, %s2590_s23 }
 0x4f9   :  { %v2206_v11 = vpop.eup %2205 }
 0x4fa   :  { %v791_v13 = vsel %vm350_vm2, %v2206_v11, 0.0 }
 0x4fc   :  { %v2981_v14 = vpop.eup %2207 }
 0x4fd   :  { %v788_v47 = vsel %vm350_vm2, %v2981_v14, 0.0 }
 0x514   :  { %792 = vadd.xlane.f32.xlu0 %v791_v13 }
 0x518   :  { %789 = vadd.xlane.f32.xlu1 %v788_v47 }
 0x529   :  { %1037 = vrot.lane.b32.xlu1 %v2897_v53, %s2590_s23 }
 0x55c   :  { %v748_v39 = vpop.xlane.xlu0 %747 }
 0x55d   :  { %v766_v48 = vsub.f32 %v490_v26, %v748_v39 }
 0x55f   :  { %v776_v12 = vmul.f32 1.442695, %v766_v48 }
 0x560   :  { %v751_v16 = vpop.xlane.xlu0 %750 }
 0x561   :  { %2209 = vpow2.f32 %v776_v12  ;;  %v767_v17 = vsub.f32 %v539_v33, %v751_v16  ;;  %v1237_v16 = vld [vmem:[#allocation7] sm:$0xf] }
 0x563   :  { %v778_v18 = vmul.f32 1.442695, %v767_v17 }
 0x564   :  { %v754_v19 = vpop.xlane.xlu1 %753  ;;  %v757_v22 = vpop.xlane.xlu0 %756 }
 0x565   :  { %2211 = vpow2.f32 %v778_v18  ;;  %v768_v20 = vsub.f32 %v588_v42, %v754_v19  ;;  %v769_v38 = vsub.f32 %v2964_v41, %v757_v22  ;;  %v1249_v19 = vsel %vm849_vm3, %v1237_v16, 0 }
 0x567   :  { %v780_v21 = vmul.f32 1.442695, %v768_v20  ;;  %v782_v40 = vmul.f32 1.442695, %v769_v38 }
 0x569   :  { %2213 = vpow2.f32 %v780_v21 }
 0x56b   :  { %v2987_v23 = vpop.eup %2209 }
 0x56c   :  { %v763_v24 = vpop.xlane.xlu0 %762  ;;  %v760_v25 = vpop.xlane.xlu1 %759  ;;  %v794_v53 = vsel %vm350_vm2, %v2987_v23, 0.0 }
 0x56d   :  { %v770_v27 = vsub.f32 %v686_v57, %v760_v25  ;;  %795 = vadd.xlane.f32.xlu1 %v794_v53  ;;  %v771_v42 = vsub.f32 %v2969_v60, %v763_v24 }
 0x56f   :  { %v2991_v26 = vpop.eup %2211  ;;  %v784_v28 = vmul.f32 1.442695, %v770_v27  ;;  %v786_v43 = vmul.f32 1.442695, %v771_v42 }
 0x570   :  { %v894_v29 = vpop.permute.xlu0 %893  ;;  %v797_v30 = vsel %vm350_vm2, %v2991_v26, 0.0  ;;  %v942_v44 = vpop.permute.xlu1 %941 }
 0x571   :  { %v899_v33 = vsel %vm849_vm3, %v894_v29, 0  ;;  %798 = vadd.xlane.f32.xlu0 %v797_v30  ;;  %2215 = vpow2.f32 %v784_v28  ;;  %v947_v62 = vsel %vm849_vm3, %v942_v44, 0  ;;  %v1238_v28 = vld [vmem:[#allocation7 + $0x4] sm:$0xf] }
 0x572   :  { %2044 = vmatpush3.bf16.msra.mxu0 %v899_v33  ;;  %2217 = vpow2.f32 %v782_v40  ;;  %v1295_v30 = vsel %vm849_vm3, %v1238_v28, 0  ;;  %v1240_v33 = vld [vmem:[#allocation7 + $0xc] sm:$0xf]  ;;  %v1239_v40 = vld [vmem:[#allocation7 + $0x8] sm:$0xf] }
 0x573   :  { %2055 = vmatprep.subr.bf16.mxu0 %v2606_v15  ;;  %v2997_v34 = vpop.eup %2213  ;;  %2219 = vpow2.f32 %v786_v43 }
 0x574   :  { %v800_v35 = vsel %vm350_vm2, %v2997_v34, 0.0  ;;  %v990_v45 = vpop.permute.xlu1 %989 }
 0x575   :  { %801 = vadd.xlane.f32.xlu1 %v800_v35  ;;  %v995_v57 = vsel %vm849_vm3, %v990_v45, 0 }
 0x57b   :  { %v3001_v36 = vpop.eup %2215 }
 0x57c   :  { %v806_v37 = vsel %vm350_vm2, %v3001_v36, 0.0  ;;  %v3011_v49 = vpop.eup %2217 }
 0x57d   :  { %807 = vadd.xlane.f32.xlu1 %v806_v37  ;;  %v3015_v51 = vpop.eup %2219  ;;  %v1387_v37 = vsel %vm849_vm3, %v1240_v33, 0 }
 0x587   :  { %1085 = vrot.lane.b32.xlu0 %v2895_v52, %s2590_s23  ;;  %v803_v52 = vsel %vm350_vm2, %v3011_v49, 0.0 }
 0x58e   :  { %1133 = vrot.lane.b32.xlu1 %v2907_v59, %s2590_s23  ;;  %v809_v59 = vsel %vm350_vm2, %v3015_v51, 0.0 }
 0x5a1   :  { %v793_v46 = vpop.xlane.xlu0 %792 }
 0x5a2   :  { %2221 = vrcp.f32 %v793_v46  ;;  %v1341_v46 = vsel %vm849_vm3, %v1239_v40, 0 }
 0x5a5   :  { %v790_v50 = vpop.xlane.xlu1 %789 }
 0x5a6   :  { %2223 = vrcp.f32 %v790_v50  ;;  %804 = vadd.xlane.f32.xlu0 %v803_v52  ;;  %v1241_v52 = vld [vmem:[#allocation7 + $0x10] sm:$0xf] }
 0x5a9   :  { %v1038_v63 = vpop.permute.xlu1 %1037 }
 0x5aa   :  { %810 = vadd.xlane.f32.xlu0 %v809_v59  ;;  %v1043_v7 = vsel %vm849_vm3, %v1038_v63, 0 }
 0x5ac   :  { %v2222_v41 = vpop.eup %2221 }
 0x5ad   :  { %v821_v54 = vmul.f32 %v2222_v41, %v2206_v11 }
 0x5af   :  { %829 = vst.msk [vmem:[#allocation23 + $0x8] sm:$0xff] %vm350_vm2, %v821_v54  ;;  %v837_v55 = vpack.c.bf16 %v821_v54, %v821_v54  ;;  %v1433_v54 = vsel %vm849_vm3, %v1241_v52, 0 }
 0x5b0   :  { %v2224_v56 = vpop.eup %2223 }
 0x5b1   :  { %v820_v60 = vmul.f32 %v2224_v56, %v2981_v14  ;;  %2046 = vmatmul.mubr.msk.bf16.vlgmr.msra.gmra.mrb[16].mxu0 %vm350_vm2, %v837_v55  ;;  %v1242_v56 = vld [vmem:[#allocation7 + $0x14] sm:$0xf] }
 0x5b2   :  { %2056 = vmatpush3.bf16.msra.mxu0 %v995_v57  ;;  %2057 = vmatprep.mubr.msk.bf16.mxu0 %vm2607_vm1, %v2606_v15  ;;  %v1479_v63 = vsel %vm849_vm3, %v1242_v56, 0 }
 0x5b3   :  { %828 = vst.msk [vmem:[#allocation23] sm:$0xff] %vm350_vm2, %v820_v60  ;;  %v836_v61 = vpack.c.bf16 %v820_v60, %v820_v60  ;;  %2067 = vmatprep.subr.bf16.mxu0 %v2606_v15 }
 0x5b5   :  { %2040 = vmatmul.mubr.msk.bf16.vlgmr.msra.gmra.mrb[20].mxu1 %vm350_vm2, %v836_v61 }
 0x5b6   :  { %2050 = vmatpush3.bf16.msra.mxu1 %v947_v62  ;;  %2051 = vmatprep.mubr.msk.bf16.mxu1 %vm2607_vm1, %v2606_v15 }
 0x5b7   :  { %2061 = vmatprep.subr.bf16.mxu1 %v2606_v15 }
 0x5c0   :  { %1181 = vrot.lane.b32.xlu0 %v2905_v58, %s2590_s23  ;;  %s2612_s23 = smov [#allocation23]  }
 0x5c1   :  { %s1846_s15 = sshll.u32 %s2612_s23, 4  ;;  %s1847_s15 = int_to_ptr.vmem [resolvable:$true] %s1846_s15 }
 0x5c2   :  { %s2527_s19 = scalar_lea.vmem %s1847_s15, 1024  ;;  %p2532_p7 = scmp.lt.s32.totalorder %s1847_s15, %s1847_s15 }
 0x5c3   :  { %p2528_p6 = scmp.ne.s32.totalorder %s1847_s15, %s2527_s19  ;;  %p2533_p8 = scmp.lt.s32.totalorder %s2527_s19, %s2527_s19 }
 0x5c5   :  { %p2534_p9 = por %p2533_p8, %p2532_p7 }
 0x5c7   :  { %p2535_p10 = pnand %p2534_p9, %p2528_p6 }
 0x5fa   :  { %v796_v0 = vpop.xlane.xlu1 %795 }
 0x5fb   :  { %2225 = vrcp.f32 %v796_v0 }
 0x5fe   :  { %v799_v1 = vpop.xlane.xlu0 %798 }
 0x5ff   :  { %2227 = vrcp.f32 %v799_v1 }
 0x602   :  { %v802_v2 = vpop.xlane.xlu1 %801  ;;  %v1086_v58 = vpop.permute.xlu0 %1085 }
 0x603   :  { %2229 = vrcp.f32 %v802_v2  ;;  %v1091_v13 = vsel %vm849_vm3, %v1086_v58, 0  ;;  %v1243_v2 = vld [vmem:[#allocation7 + $0x18] sm:$0xf] }
 0x605   :  { %v2226_v3 = vpop.eup %2225 }
 0x606   :  { %v822_v4 = vmul.f32 %v2226_v3, %v2987_v23 }
 0x608   :  { %830 = vst.msk [vmem:[#allocation23 + $0x10] sm:$0xff] %vm350_vm2, %v822_v4  ;;  %v838_v5 = vpack.c.bf16 %v822_v4, %v822_v4 }
 0x609   :  { %v2228_v6 = vpop.eup %2227 }
 0x60a   :  { %v823_v8 = vmul.f32 %v2228_v6, %v2991_v26  ;;  %2052 = vmatmul.mubr.msk.bf16.vlgmr.msra.gmra.mrb[24].mxu1 %vm350_vm2, %v838_v5  ;;  %v808_v9 = vpop.xlane.xlu1 %807  ;;  %v1525_v6 = vsel %vm849_vm3, %v1243_v2, 0 }
 0x60b   :  { %2062 = vmatpush3.bf16.msra.mxu1 %v1043_v7  ;;  %2063 = vmatprep.mubr.msk.bf16.mxu1 %vm2607_vm1, %v2606_v15  ;;  %2231 = vrcp.f32 %v808_v9 }
 0x60c   :  { %831 = vst.msk [vmem:[#allocation23 + $0x18] sm:$0xff] %vm350_vm2, %v823_v8  ;;  %v839_v10 = vpack.c.bf16 %v823_v8, %v823_v8  ;;  %2073 = vmatprep.subr.bf16.mxu1 %v2606_v15 }
 0x60d   :  { %v2230_v11 = vpop.eup %2229 }
 0x60e   :  { %2058 = vmatmul.mubr.msk.bf16.vlgmr.msra.gmra.mrb[20].mxu0 %vm350_vm2, %v839_v10  ;;  %v824_v14 = vmul.f32 %v2230_v11, %v2997_v34  ;;  %v1134_v47 = vpop.permute.xlu1 %1133 }
 0x60f   :  { %2068 = vmatpush3.bf16.msra.mxu0 %v1091_v13  ;;  %2069 = vmatprep.mubr.msk.bf16.mxu0 %vm2607_vm1, %v2606_v15  ;;  %v1139_v48 = vsel %vm849_vm3, %v1134_v47, 0 }
 0x610   :  { %2079 = vmatprep.subr.bf16.mxu0 %v2606_v15  ;;  %832 = vst.msk [vmem:[#allocation23 + $0x20] sm:$0xff] %vm350_vm2, %v824_v14  ;;  %v840_v39 = vpack.c.bf16 %v824_v14, %v824_v14  ;;  %v1244_v14 = vld [vmem:[#allocation7 + $0x1c] sm:$0xf] }
 0x612   :  { %2064 = vmatmul.mubr.msk.bf16.vlgmr.msra.gmra.mrb[28].mxu1 %vm350_vm2, %v840_v39 }
 0x613   :  { %2074 = vmatpush3.bf16.msra.mxu1 %v1139_v48  ;;  %2075 = vmatprep.mubr.msk.bf16.mxu1 %vm2607_vm1, %v2606_v15 }
 0x614   :  { %2085 = vmatprep.subr.bf16.mxu1 %v2606_v15 }
 0x615   :  { %v2232_v12 = vpop.eup %2231 }
 0x616   :  { %v826_v17 = vmul.f32 %v2232_v12, %v3001_v36  ;;  %v1571_v12 = vsel %vm849_vm3, %v1244_v14, 0 }
 0x618   :  { %834 = vst.msk [vmem:[#allocation23 + $0x30] sm:$0xff] %vm350_vm2, %v826_v17  ;;  %v842_v18 = vpack.c.bf16 %v826_v17, %v826_v17 }
 0x61a   :  { %2076 = vmatmul.mubr.msk.bf16.vlgmr.msra.gmra.mrb[32].mxu1 %vm350_vm2, %v842_v18 }
 0x61b   :  { %2086 = vmatpush3.bf16.msra.mxu1 %v1249_v19  ;;  %2087 = vmatprep.mubr.msk.bf16.mxu1 %vm2607_vm1, %v2606_v15 }
 0x61c   :  { %2097 = vmatprep.subr.bf16.mxu1 %v2606_v15 }
 0x633   :  { %v805_v20 = vpop.xlane.xlu0 %804 }
 0x634   :  { %2233 = vrcp.f32 %v805_v20 }
 0x637   :  { %v811_v21 = vpop.xlane.xlu0 %810 }
 0x638   :  { %2235 = vrcp.f32 %v811_v21 }
 0x63b   :  { %v1182_v24 = vpop.permute.xlu0 %1181 }
 0x63c   :  { %v1187_v26 = vsel %vm849_vm3, %v1182_v24, 0 }
 0x63e   :  { %v2234_v22 = vpop.eup %2233 }
 0x63f   :  { %v825_v23 = vmul.f32 %v2234_v22, %v3011_v49 }
 0x641   :  { %833 = vst.msk [vmem:[#allocation23 + $0x28] sm:$0xff] %vm350_vm2, %v825_v23  ;;  %v841_v25 = vpack.c.bf16 %v825_v23, %v825_v23 }
 0x642   :  { %v2236_v53 = vpop.eup %2235 }
 0x643   :  { %v827_v27 = vmul.f32 %v2236_v53, %v3015_v51  ;;  %2070 = vmatmul.mubr.msk.bf16.vlgmr.msra.gmra.mrb[24].mxu0 %vm350_vm2, %v841_v25 }
 0x644   :  { %2080 = vmatpush3.bf16.msra.mxu0 %v1187_v26  ;;  %2081 = vmatprep.mubr.msk.bf16.mxu0 %vm2607_vm1, %v2606_v15 }
 0x645   :  { %835 = vst.msk [vmem:[#allocation23 + $0x38] sm:$0xff] %vm350_vm2, %v827_v27  ;;  %2091 = vmatprep.subr.bf16.mxu0 %v2606_v15  ;;  %v843_v29 = vpack.c.bf16 %v827_v27, %v827_v27 }
 0x64b   :  { %2082 = vmatmul.mubr.msk.bf16.vlgmr.msra.gmra.mrb[28].mxu0 %vm350_vm2, %v843_v29 }
 0x64c   :  { %2092 = vmatpush3.bf16.msra.mxu0 %v1295_v30  ;;  %2093 = vmatprep.mubr.msk.bf16.mxu0 %vm2607_vm1, %v2606_v15 }
 0x64d   :  { %2103 = vmatprep.subr.bf16.mxu0 %v2606_v15 }
 0x684   :  { %v935_v34 = vpop.f32.mrb[16].mxu0 }
 0x685   :  { %v1230_v35 = vpack.c.bf16 %v935_v34, %v935_v34  ;;  %v2047_v36 = vpop.f32.mrb[17].mxu0 }
 0x686   :  { %v938_v38 = vpop.f32.mrb[18].mxu0 }
 0x687   :  { %v2048_v42 = vpop.f32.mrb[19].mxu0  ;;  %2094 = vmatmul.mubr.msk.bf16.vlgmr.msra.gmra.mrb[32].mxu0 %vm350_vm2, %v1230_v35 }
 0x688   :  { %v887_v43 = vpop.f32.mrb[20].mxu1  ;;  %2104 = vmatpush3.bf16.msra.mxu0 %v1387_v37  ;;  %2105 = vmatprep.mubr.msk.bf16.mxu0 %vm2607_vm1, %v2606_v15 }
 0x689   :  { %v1229_v44 = vpack.c.bf16 %v887_v43, %v887_v43  ;;  %v2041_v45 = vpop.f32.mrb[21].mxu1  ;;  %2115 = vmatprep.subr.bf16.mxu0 %v2606_v15 }
 0x68a   :  { %v890_v49 = vpop.f32.mrb[22].mxu1 }
 0x68b   :  { %v2042_v50 = vpop.f32.mrb[23].mxu1  ;;  %2088 = vmatmul.mubr.msk.bf16.vlgmr.msra.gmra.mrb[36].mxu1 %vm350_vm2, %v1229_v44 }
 0x68c   :  { %2098 = vmatpush3.bf16.msra.mxu1 %v1341_v46  ;;  %2099 = vmatprep.mubr.msk.bf16.mxu1 %vm2607_vm1, %v2606_v15 }
 0x68d   :  { %2109 = vmatprep.subr.bf16.mxu1 %v2606_v15 }
 0x6dd   :  { %v983_v51 = vpop.f32.mrb[24].mxu1 }
 0x6de   :  { %v1231_v59 = vpack.c.bf16 %v983_v51, %v983_v51  ;;  %v2053_v41 = vpop.f32.mrb[25].mxu1 }
 0x6df   :  { %v986_v55 = vpop.f32.mrb[26].mxu1 }
 0x6e0   :  { %v2054_v57 = vpop.f32.mrb[27].mxu1  ;;  %2100 = vmatmul.mubr.msk.bf16.vlgmr.msra.gmra.mrb[40].mxu1 %vm350_vm2, %v1231_v59 }
 0x6e1   :  { %v1031_v60 = vpop.f32.mrb[20].mxu0  ;;  %2110 = vmatpush3.bf16.msra.mxu1 %v1433_v54  ;;  %2111 = vmatprep.mubr.msk.bf16.mxu1 %vm2607_vm1, %v2606_v15  ;;  %v1909_v57 = vld [vmem:[#allocation8] ss:$0 sm:$0xff] }
 0x6e2   :  { %v1232_v61 = vpack.c.bf16 %v1031_v60, %v1031_v60  ;;  %v2059_v62 = vpop.f32.mrb[21].mxu0  ;;  %2121 = vmatprep.subr.bf16.mxu1 %v2606_v15 }
 0x6e3   :  { %v1034_v0 = vpop.f32.mrb[22].mxu0 }
 0x6e4   :  { %v2060_v1 = vpop.f32.mrb[23].mxu0  ;;  %2106 = vmatmul.mubr.msk.bf16.vlgmr.msra.gmra.mrb[36].mxu0 %vm350_vm2, %v1232_v61 }
 0x6e5   :  { %2116 = vmatpush3.bf16.msra.mxu0 %v1479_v63  ;;  %2117 = vmatprep.mubr.msk.bf16.mxu0 %vm2607_vm1, %v2606_v15  ;;  %v1079_v3 = vpop.f32.mrb[28].mxu1 }
 0x6e6   :  { %2127 = vmatprep.subr.bf16.mxu0 %v2606_v15  ;;  %v1233_v4 = vpack.c.bf16 %v1079_v3, %v1079_v3  ;;  %v2065_v5 = vpop.f32.mrb[29].mxu1 }
 0x6e7   :  { %v1082_v7 = vpop.f32.mrb[30].mxu1 }
 0x6e8   :  { %v2066_v8 = vpop.f32.mrb[31].mxu1  ;;  %2112 = vmatmul.mubr.msk.bf16.vlgmr.msra.gmra.mrb[44].mxu1 %vm350_vm2, %v1233_v4 }
 0x6e9   :  { %2122 = vmatpush3.bf16.msra.mxu1 %v1525_v6  ;;  %2123 = vmatprep.mubr.msk.bf16.mxu1 %vm2607_vm1, %v2606_v15 }
 0x6ea   :  { %2133 = vmatprep.subr.bf16.mxu1 %v2606_v15 }
 0x6ed   :  { %v1175_v58 = vpop.f32.mrb[32].mxu1 }
 0x6ee   :  { %v1235_v9 = vpack.c.bf16 %v1175_v58, %v1175_v58  ;;  %v2077_v10 = vpop.f32.mrb[33].mxu1 }
 0x6ef   :  { %v1178_v11 = vpop.f32.mrb[34].mxu1 }
 0x6f0   :  { %v2078_v13 = vpop.f32.mrb[35].mxu1  ;;  %2124 = vmatmul.mubr.msk.bf16.vlgmr.msra.gmra.mrb[48].mxu1 %vm350_vm2, %v1235_v9 }
 0x6f1   :  { %2137 = vmatprep.mubr.msk.bf16.mxu1 %vm2607_vm1, %v2606_v15 }
 0x716   :  { %v1127_v47 = vpop.f32.mrb[24].mxu0 }
 0x717   :  { %v1234_v39 = vpack.c.bf16 %v1127_v47, %v1127_v47  ;;  %v2071_v48 = vpop.f32.mrb[25].mxu0 }
 0x718   :  { %v1130_v16 = vpop.f32.mrb[26].mxu0 }
 0x719   :  { %v2072_v17 = vpop.f32.mrb[27].mxu0  ;;  %2118 = vmatmul.mubr.msk.bf16.vlgmr.msra.gmra.mrb[40].mxu0 %vm350_vm2, %v1234_v39 }
 0x71a   :  { %2128 = vmatpush3.bf16.msra.mxu0 %v1571_v12  ;;  %2129 = vmatprep.mubr.msk.bf16.mxu0 %vm2607_vm1, %v2606_v15 }
 0x71b   :  { %2141 = vmatprep.subr.bf16.mxu0 %v2606_v15 }
 0x71e   :  { %v1223_v18 = vpop.f32.mrb[28].mxu0 }
 0x71f   :  { %v1236_v19 = vpack.c.bf16 %v1223_v18, %v1223_v18  ;;  %v2083_v20 = vpop.f32.mrb[29].mxu0 }
 0x720   :  { %v1226_v21 = vpop.f32.mrb[30].mxu0 }
 0x721   :  { %v2084_v22 = vpop.f32.mrb[31].mxu0  ;;  %2130 = vmatmul.mubr.msk.bf16.vlgmr.msra.gmra.mrb[44].mxu0 %vm350_vm2, %v1236_v19 }
 0x722   :  { %2149 = vmatprep.mubr.msk.bf16.mxu0 %vm2607_vm1, %v2606_v15 }
 0x75a   :  { %v1331_v23 = vpop.f32.mrb[32].mxu0 }
 0x75b   :  { %v2095_v24 = vpop.f32.mrb[33].mxu0  ;;  %v1620_v42 = vsel %vm213_vm0, %v1331_v23, 0.0  ;;  %v2195_v23 = vld [vmem:[#allocation16] sm:$0xff]  }
 0x75c   :  { %v1334_v25 = vpop.f32.mrb[34].mxu0  ;;  %2134 = vmatpush3.bf16.msra.mxu1 %v2195_v23  ;;  %v2196_v24 = vld [vmem:[#allocation16 + $0x8] sm:$0xff]  }
 0x75d   :  { %v2096_v53 = vpop.f32.mrb[35].mxu0  ;;  %2135 = vmatprep.subr.bf16.mxu1 %v2606_v15  ;;  %v2197_v25 = vld [vmem:[#allocation19] sm:$0xff]  }
 0x75e   :  { %v1285_v27 = vpop.f32.mrb[36].mxu1  ;;  %2142 = vmatpush3.bf16.msra.mxu0 %v2197_v25  ;;  %v2198_v53 = vld [vmem:[#allocation19 + $0x8] sm:$0xff]  }
 0x75f   :  { %v2089_v26 = vpop.f32.mrb[37].mxu1  ;;  %v1613_v33 = vsel %vm213_vm0, %v1285_v27, 0.0  ;;  %2143 = vmatprep.subr.bf16.mxu0 %v2606_v15 }
 0x760   :  { %v1288_v28 = vpop.f32.mrb[38].mxu1  ;;  %2136 = vmatpush3.bf16.msra.mxu1 %v2196_v24 }
 0x761   :  { %v2090_v29 = vpop.f32.mrb[39].mxu1 }
 0x762   :  { %2144 = vmatpush3.bf16.msra.mxu0 %v2198_v53 }
 0x763   :  { %2145 = vmatprep.subr.bf16.mxu0 %v2606_v15 }
 0x7b3   :  { %v1377_v30 = vpop.f32.mrb[40].mxu1 }
 0x7b4   :  { %v1614_v34 = vsel %vm213_vm0, %v1377_v30, 0.0  ;;  %v2101_v35 = vpop.f32.mrb[41].mxu1 }
 0x7b5   :  { %v1615_v36 = vadd.f32 %v1614_v34, %v1613_v33  ;;  %v1380_v37 = vpop.f32.mrb[42].mxu1 }
 0x7b6   :  { %v2102_v38 = vpop.f32.mrb[43].mxu1 }
 0x7b7   :  { %v1423_v40 = vpop.f32.mrb[36].mxu0 }
 0x7b8   :  { %v1621_v43 = vsel %vm213_vm0, %v1423_v40, 0.0  ;;  %v2107_v44 = vpop.f32.mrb[37].mxu0 }
 0x7b9   :  { %v1622_v45 = vadd.f32 %v1621_v43, %v1620_v42  ;;  %v1426_v46 = vpop.f32.mrb[38].mxu0  ;;  %v1911_v42 = vld [vmem:[#allocation14] ss:$0 sm:$0xff] }
 0x7ba   :  { %v2108_v49 = vpop.f32.mrb[39].mxu0 }
 0x7bb   :  { %v1469_v50 = vpop.f32.mrb[44].mxu1  ;;  %v2199_v49 = vld [vmem:[#allocation19 + $0x10] sm:$0xff]  }
 0x7bc   :  { %v1616_v52 = vsel %vm213_vm0, %v1469_v50, 0.0  ;;  %v2113_v51 = vpop.f32.mrb[45].mxu1  ;;  %2146 = vmatpush3.bf16.msra.mxu0 %v2199_v49  ;;  %v2200_v50 = vld [vmem:[#allocation19 + $0x18] sm:$0xff]  }
 0x7bd   :  { %v1617_v59 = vadd.f32 %v1616_v52, %v1615_v36  ;;  %v1472_v41 = vpop.f32.mrb[46].mxu1  ;;  %v1910_v36 = vld [vmem:[#allocation13] ss:$0 sm:$0xff]  ;;  %2147 = vmatprep.subr.bf16.mxu0 %v2606_v15  ;;  %v1912_v52 = vld [vmem:[#allocation17] ss:$0 sm:$0xff] }
 0x7be   :  { %v2114_v54 = vpop.f32.mrb[47].mxu1 }
 0x7c0   :  { %2148 = vmatpush3.bf16.msra.mxu0 %v2200_v50 }
 0x7c3   :  { %v1561_v55 = vpop.f32.mrb[48].mxu1 }
 0x7c4   :  { %v1618_v56 = vsel %vm213_vm0, %v1561_v55, 0.0  ;;  %v2125_v60 = vpop.f32.mrb[49].mxu1 }
 0x7c5   :  { %v1619_v61 = vadd.f32 %v1618_v56, %v1617_v59  ;;  %v1564_v62 = vpop.f32.mrb[50].mxu1 }
 0x7c6   :  { %v2126_v63 = vpop.f32.mrb[51].mxu1 }
 0x7c7   :  { %v1634_v0 = vadd.f32 %v1909_v57, %v1619_v61 }
 0x7c9   :  { %v3119_v1 = vadd.f32 %v1634_v0, %v2872_v31 }
 0x7cb   :  { %v1640_v2 = vsel %vm213_vm0, %v3119_v1, 0.0 }
 0x7cc   :  { %1641 = vadd.xlane.f32.xlu1 %v1640_v2 }
 0x7ec   :  { %v1515_v3 = vpop.f32.mrb[40].mxu0 }
 0x7ed   :  { %v1623_v4 = vsel %vm213_vm0, %v1515_v3, 0.0  ;;  %v2119_v5 = vpop.f32.mrb[41].mxu0 }
 0x7ee   :  { %v1624_v6 = vadd.f32 %v1623_v4, %v1622_v45  ;;  %v1518_v7 = vpop.f32.mrb[42].mxu0 }
 0x7ef   :  { %v2120_v8 = vpop.f32.mrb[43].mxu0 }
 0x7f4   :  { %v1607_v58 = vpop.f32.mrb[44].mxu0 }
 0x7f5   :  { %v1625_v9 = vsel %vm213_vm0, %v1607_v58, 0.0  ;;  %v2131_v10 = vpop.f32.mrb[45].mxu0 }
 0x7f6   :  { %v1626_v11 = vadd.f32 %v1625_v9, %v1624_v6  ;;  %v1610_v13 = vpop.f32.mrb[46].mxu0 }
 0x7f7   :  { %v2132_v14 = vpop.f32.mrb[47].mxu0 }
 0x7f8   :  { %v1635_v31 = vadd.f32 %v1909_v57, %v1626_v11 }
 0x7fa   :  { %v3126_v47 = vadd.f32 %v1635_v31, %v2874_v32 }
 0x7fc   :  { %v1643_v39 = vsel %vm213_vm0, %v3126_v47, 0.0 }
 0x7fd   :  { %1644 = vadd.xlane.f32.xlu0 %v1643_v39 }
 0x859   :  { %v1642_v48 = vpop.xlane.xlu1 %1641 }
 0x85a   :  { %v1646_v12 = vmul.f32 0.03125, %v1642_v48 }
 0x85c   :  { %v1648_v16 = vsub.f32 %v3119_v1, %v1646_v12 }
 0x85e   :  { %v1650_v17 = vmul.f32 %v1648_v16, %v1648_v16 }
 0x860   :  { %v1652_v18 = vsel %vm213_vm0, %v1650_v17, 0.0 }
 0x861   :  { %1653 = vadd.xlane.f32.xlu0 %v1652_v18 }
 0x88a   :  { %v1645_v19 = vpop.xlane.xlu0 %1644 }
 0x88b   :  { %v1647_v20 = vmul.f32 0.03125, %v1645_v19 }
 0x88d   :  { %v1649_v21 = vsub.f32 %v3126_v47, %v1647_v20 }
 0x88f   :  { %v1651_v22 = vmul.f32 %v1649_v21, %v1649_v21 }
 0x891   :  { %v1655_v32 = vsel %vm213_vm0, %v1651_v22, 0.0 }
 0x892   :  { %1656 = vadd.xlane.f32.xlu0 %v1655_v32 }
 0x8ee   :  { %v1654_v27 = vpop.xlane.xlu0 %1653 }
 0x8ef   :  { %v1658_v26 = vmul.f32 0.03125, %v1654_v27 }
 0x8f1   :  { %v1660_v28 = vadd.f32 1e-05, %v1658_v26 }
 0x8f3   :  { %2237 = vrsqrt.f32 %v1660_v28 }
 0x8fd   :  { %v2238_v34 = vpop.eup %2237 }
 0x8fe   :  { %v1664_v35 = vmul.f32 %v2238_v34, %v1648_v16 }
 0x900   :  { %v1672_v38 = vmul.f32 %v1910_v36, %v1664_v35 }
 0x902   :  { %v1680_v44 = vadd.f32 %v1911_v42, %v1672_v38 }
 0x91f   :  { %v1657_v29 = vpop.xlane.xlu0 %1656 }
 0x920   :  { %v1659_v30 = vmul.f32 0.03125, %v1657_v29 }
 0x922   :  { %v1661_v33 = vadd.f32 1e-05, %v1659_v30 }
 0x924   :  { %2239 = vrsqrt.f32 %v1661_v33 }
 0x92e   :  { %v2240_v37 = vpop.eup %2239 }
 0x92f   :  { %v1665_v40 = vmul.f32 %v2240_v37, %v1649_v21 }
 0x931   :  { %v1673_v43 = vmul.f32 %v1910_v36, %v1665_v40 }
 0x933   :  { %v1681_v45 = vadd.f32 %v1911_v42, %v1673_v43 }
 0x935   :  { %v1682_v46 = vpack.c.bf16 %v1681_v45, %v1680_v44 }
 0x937   :  { %2138 = vmatmul.mubr.msk.bf16.vlgmr.msra.gmra.mrb[52].mxu1 %vm213_vm0, %v1682_v46 }
 0xa0a   :  { %v1743_v51 = vpop.f32.mrb[52].mxu1 }
 0xa0b   :  { %v1744_v59 = vadd.f32 %v1912_v52, %v1743_v51  ;;  %v2139_v41 = vpop.f32.mrb[53].mxu1 }
 0xa0c   :  { %v1746_v54 = vpop.f32.mrb[54].mxu1 }
 0xa0d   :  { %v1747_v55 = vadd.f32 %v1912_v52, %v1746_v54  ;;  %v2140_v56 = vpop.f32.mrb[55].mxu1  ;;  %v1750_v57 = vmax.f32 %v1744_v59, 0.0 }
 0xa0f   :  { %v1751_v60 = vmax.f32 %v1747_v55, 0.0 }
 0xa11   :  { %v1752_v61 = vpack.c.bf16 %v1751_v60, %v1750_v57 }
 0xa13   :  { %2150 = vmatmul.mubr.msk.bf16.vlgmr.msra.gmra.mrb[48].mxu0 %vm1792_vm4, %v1752_v61 }
 0xa14   :  { %2538 = shalt.err (!%p2535_p10)
}
 0xa15   :  { %s2539_s22 = scalar_lea.hbm %s3186_s13, 1024 }
 0xa16   :  { %p2540_p11 = scmp.ne.s32.totalorder %s3186_s13, %s2539_s22  ;;  %p2543_p12 = scmp.lt.u32.totalorder %s2539_s22, %s3186_s13 }
 0xa18   :  { %p2545_p13 = pnand %p2543_p12, %p2540_p11 }
 0xa1a   :  { %2548 = shalt.err (!%p2545_p13)
}
 0xa1b   :  { %1852 = dma.vmem_to_hbm [thread:$0]  %s1847_s15, 1024, %s3186_s13, [#allocation4], %s2598_s11, %s2598_s11, %s2599_s20   ;;  %v1916_v15 = vld [vmem:[#allocation20] ss:$0 sm:$0xff] }
 0xa1c   :  { %s2613_s1 = smov [#allocation24]  }
 0xa1d   :  { %s1858_s27 = sshll.u32 %s2613_s1, 4  ;;  %s1859_s27 = int_to_ptr.vmem [resolvable:$true] %s1858_s27 }
 0xa1e   :  { %s2549_s26 = scalar_lea.vmem %s1859_s27, 256  ;;  %p2554_p1 = scmp.lt.s32.totalorder %s1859_s27, %s1859_s27 }
 0xa1f   :  { %p2550_p0 = scmp.ne.s32.totalorder %s1859_s27, %s2549_s26  ;;  %p2555_p2 = scmp.lt.s32.totalorder %s2549_s26, %s2549_s26 }
 0xa21   :  { %p2556_p3 = por %p2555_p2, %p2554_p1 }
 0xa23   :  { %p2557_p4 = pnand %p2556_p3, %p2550_p0 }
 0xae6   :  { %v1830_v62 = vpop.f32.mrb[48].mxu0 }
 0xae7   :  { %v1831_v63 = vadd.f32 %v1916_v15, %v1830_v62  ;;  %v2151_v0 = vpop.f32.mrb[49].mxu0 }
 0xae8   :  { %v1833_v2 = vpop.f32.mrb[50].mxu0 }
 0xae9   :  { %v1837_v3 = vadd.f32 %v1831_v63, %v3119_v1  ;;  %v1834_v4 = vadd.f32 %v1916_v15, %v1833_v2  ;;  %v2152_v5 = vpop.f32.mrb[51].mxu0 }
 0xaeb   :  { %1839 = vst.msk [vmem:[#allocation24] sm:$0xff] %vm213_vm0, %v1837_v3  ;;  %v1838_v6 = vadd.f32 %v1834_v4, %v3126_v47 }
 0xaed   :  { %1840 = vst.msk [vmem:[#allocation24 + $0x8] sm:$0xff] %vm213_vm0, %v1838_v6 }
 0xaee   :  { %2560 = shalt.err (!%p2557_p4)
}
 0xaef   :  { %s2561_s2 = scalar_lea.hbm %s3187_s14, 256 }
 0xaf0   :  { %p2562_p5 = scmp.ne.s32.totalorder %s3187_s14, %s2561_s2  ;;  %p2565_p6 = scmp.lt.u32.totalorder %s2561_s2, %s3187_s14 }
 0xaf2   :  { %p2567_p7 = pnand %p2565_p6, %p2562_p5 }
 0xaf4   :  { %2570 = shalt.err (!%p2567_p7)
}
 0xaf5   :  { %1864 = dma.vmem_to_hbm [thread:$0]  %s1859_s27, 256, %s3187_s14, [#allocation25], %s2598_s11, %s2598_s11, %s2599_s20  }
 0xaf6   :  { %2585 = dma.done.wait [#allocation4], 1024  }
 0xaf7   :  { %2586 = vsyncadd [#allocation4], 4294966272 }
 0xaf8   :  { %2587 = dma.done.wait [#allocation25], 256  }
 0xaf9   :  { %2588 = vsyncadd [#allocation25], 4294967040 }
 0xafa   :  { %1871 = vsyncpa [#allocation3], 1 }
 0xafb   :  { %1872 = vsyncpa [#allocation6], 1 }
 0xafc   :  { %1873 = vsyncpa [#allocation9], 1 }
 0xafd   :  { %1874 = vsyncpa [#allocation12], 1 }
 0xafe   :  { %1875 = vsyncpa [#allocation15], 1 }
 0xaff   :  { %1876 = vsyncpa [#allocation18], 1 }
 0xb00   :  { %1877 = vsyncpa [#allocation21], 1 }
 0xb01   :  { %1878 = vsyncpa [#allocation4], 1 }
 0xb02   :  { %1879 = vsyncpa [#allocation25], 1 }

</bundles_post_ra>
